<compile_context>
chip_gen: v6e
topology: v6e:2x2x1
jax: 0.10.0
libtpu: 0.0.40
codegen_flags: <defaults>
</compile_context>

<pallas_src>
import functools

import jax
import jax.numpy as jnp
from jax import lax
from jax.experimental import pallas as pl
from jax.experimental.pallas import tpu as pltpu


def _round_up(x, m):
    return (x + m - 1) // m * m


def lstm_baseline_kernel(x_ref, wih_ref, whh_ref, bias_ref,
                         w1_ref, b1_ref, w2_ref, b2_ref, w3_ref, b3_ref,
                         out_ref,
                         xproj_scr, h_scr, c_scr,
                         *, num_classes, seq_len, time_mask, unroll):
    """One (batch-shard, time-chunk) grid step.

    x_ref:    (Tc, Bb, I)   bf16  time-major chunk of the input
    wih_ref:  (I, 4*Hp)     bf16  per-gate 128-lane aligned
    whh_ref:  (Hp, 4*Hp)    bf16
    bias_ref: (1, 4*Hp)     f32   b_ih + b_hh (folded into the per-step add)
    w1/b1, w2/b2, w3/b3:          MLP head (lane-padded)
    out_ref:  (Bb, Cp)      f32   lane-dense output (written at last chunk)
    xproj_scr:(Tc, Bb, 4Hp) bf16  hoisted input projection for this chunk
    h_scr/c_scr: (Bb, Hp)   f32   recurrence state, persistent across chunks
    """
    t_blk = pl.program_id(1)
    n_t = pl.num_programs(1)
    Tc, Bb, G4 = xproj_scr.shape
    I = x_ref.shape[-1]
    Hp = whh_ref.shape[0]

    # ---- Reset persistent recurrence state at the start of each batch shard's
    #      time sweep (matches Variable(torch.zeros(...)) initial state). ------
    @pl.when(t_blk == 0)
    def _init_state():
        h_scr[...] = jnp.zeros_like(h_scr)
        c_scr[...] = jnp.zeros_like(c_scr)

    # ---- Hoisted input projection for this chunk: one (Tc*Bb, I)@(I, 4Hp)
    #      MXU matmul; stored as bf16 (halves vst traffic and scratch VMEM). ---
    xp = jnp.dot(x_ref[...].reshape(Tc * Bb, I), wih_ref[...],
                 preferred_element_type=jnp.float32)
    xproj_scr[...] = xp.astype(xproj_scr.dtype).reshape(Tc, Bb, G4)

    whh = whh_ref[...]          # loop-invariant RHS
    bias = bias_ref[...]        # f32, added inside the f32 recurrence
    # TODO(synk): relies on Mosaic hoisting the loop-invariant MXU RHS latch for
    # whh across the unrolled time steps; explicit pltpu.matmul_push_rhs driving
    # is the next lever if the bundle dump shows per-step RHS pushes.

    def step(t, carry):
        h, c = carry                                            # f32 (Bb, Hp)
        gates = (xproj_scr[t].astype(jnp.float32) + bias
                 + jnp.dot(h.astype(whh.dtype), whh,
                           preferred_element_type=jnp.float32))
        # Each gate slice is 128-lane aligned -> clean vreg views.
        i_g = jax.nn.sigmoid(gates[:, 0 * Hp:1 * Hp])
        f_g = jax.nn.sigmoid(gates[:, 1 * Hp:2 * Hp])
        g_g = jnp.tanh(gates[:, 2 * Hp:3 * Hp])
        o_g = jax.nn.sigmoid(gates[:, 3 * Hp:4 * Hp])
        c_new = f_g * c + i_g * g_g                             # f32 recurrence
        h_new = o_g * jnp.tanh(c_new)
        if time_mask:
            # Padded tail timesteps (T rounded up to a chunk multiple) are
            # identity steps so the carried state equals the true last state.
            valid = (t_blk * Tc + t) < seq_len
            h_new = jnp.where(valid, h_new, h)
            c_new = jnp.where(valid, c_new, c)
        return h_new, c_new

    h_last, c_last = lax.fori_loop(0, Tc, step, (h_scr[...], c_scr[...]),
                                   unroll=unroll)
    h_scr[...] = h_last
    c_scr[...] = c_last

    # ---- MLP head + log_softmax, only once the whole sequence is consumed. ---
    @pl.when(t_blk == n_t - 1)
    def _head():
        y = jnp.dot(h_last.astype(w1_ref.dtype), w1_ref[...],
                    preferred_element_type=jnp.float32) + b1_ref[...]
        y = jnp.maximum(y, 0.0)                                 # ReLU
        y = jnp.dot(y.astype(w2_ref.dtype), w2_ref[...],
                    preferred_element_type=jnp.float32) + b2_ref[...]
        y = jnp.maximum(y, 0.0)                                 # ReLU
        z = jnp.dot(y.astype(w3_ref.dtype), w3_ref[...],
                    preferred_element_type=jnp.float32) + b3_ref[...]

        # Mask padded class lanes so they do not perturb the softmax (f32 path).
        col = lax.broadcasted_iota(jnp.int32, z.shape, 1)
        z = jnp.where(col < num_classes, z, -1e30)

        # TODO(synk): the reference calls F.log_softmax(x, dim=2) on a 2-D
        # tensor, which is invalid in PyTorch; implemented as log_softmax over
        # the last (class) dimension, the only sensible interpretation.
        z_max = jnp.max(z, axis=-1, keepdims=True)
        z_shift = z - z_max
        lse = jnp.log(jnp.sum(jnp.exp(z_shift), axis=-1, keepdims=True))
        out_ref[...] = z_shift - lse                            # lane-dense store


def lstm_for_baseline_forward(x, params, *, t_chunk=32, num_batch_shards=1):
    """x: (B, T, input_size).  Returns log-probs of shape (B, num_classes).

    num_batch_shards=2 adds a 'parallel' batch axis to use both TensorCores on
    v7x; keep 1 on single-core chips (v5e/v6e) to avoid serialising two full
    recurrences on one core.
    """
    B, T, I = x.shape
    H = params["w_hh"].shape[1]          # w_hh: (4H, H)
    H1 = params["w1"].shape[0]           # hidden_size // 2
    C = params["w3"].shape[0]            # num_classes

    Bp = _round_up(max(B, 1), 8 * num_batch_shards)   # sublane-aligned, shardable
    Bb = Bp // num_batch_shards
    Hp = _round_up(H, 128)               # lane-aligned hidden -> aligned gate slices
    H1p = _round_up(H1, 128)
    Cp = _round_up(C, 128)               # lane-dense output

    Tc = min(t_chunk, T)                 # time-chunk size (VMEM is O(Tc))
    Tp = _round_up(T, Tc)
    n_t = Tp // Tc
    unroll = Tc if Tc <= 8 else 8        # bounded unroll: ILP without code bloat

    f32, bf16 = jnp.float32, jnp.bfloat16

    def pad2(a, r, c):
        return jnp.pad(a, ((0, r - a.shape[0]), (0, c - a.shape[1])))

    def pad1(a, n):
        return jnp.pad(a, (0, n - a.shape[0]))

    # Repack stacked (i,f,g,o) gate weights so each gate starts on an Hp boundary.
    def pack_gate_weight(w, in_dim_pad):
        blocks = [pad2(w[k * H:(k + 1) * H], Hp, in_dim_pad) for k in range(4)]
        return jnp.concatenate(blocks, axis=0).T            # (in_dim_pad, 4*Hp)

    def pack_gate_bias(b):
        blocks = [pad1(b[k * H:(k + 1) * H], Hp) for k in range(4)]
        return jnp.concatenate(blocks, axis=0).reshape(1, 4 * Hp)

    wih = pack_gate_weight(params["w_ih"].astype(f32), I).astype(bf16)    # (I, 4Hp)
    whh = pack_gate_weight(params["w_hh"].astype(f32), Hp).astype(bf16)   # (Hp, 4Hp)
    bias = pack_gate_bias((params["b_ih"] + params["b_hh"]).astype(f32))  # (1, 4Hp)

    w1 = pad2(params["w1"].astype(f32).T, Hp, H1p).astype(bf16)           # (Hp, H1p)
    b1 = pad1(params["b1"].astype(f32), H1p).reshape(1, H1p)
    w2 = pad2(params["w2"].astype(f32).T, H1p, H1p).astype(bf16)          # (H1p, H1p)
    b2 = pad1(params["b2"].astype(f32), H1p).reshape(1, H1p)
    w3 = pad2(params["w3"].astype(f32).T, H1p, Cp).astype(bf16)           # (H1p, Cp)
    b3 = pad1(params["b3"].astype(f32), Cp).reshape(1, Cp)

    # Cast to bf16 FIRST, then transpose/pad to time-major (halves the
    # wrapper-side HBM traffic of the preprocessing step).
    x_tm = jnp.transpose(x.astype(bf16), (1, 0, 2))                       # (T, B, I)
    x_tm = jnp.pad(x_tm, ((0, Tp - T), (0, Bp - B), (0, 0)))              # (Tp, Bp, I)

    # ---- Explicit VMEM budget (resident blocks * double-buffering + headroom).
    b16, b32 = 2, 4
    x_blk = Tc * Bb * I * b16
    wts = ((I + Hp) * 4 * Hp + Hp * H1p + H1p * H1p + H1p * Cp) * b16 \
        + (4 * Hp + 2 * H1p + Cp) * b32
    scr = Tc * Bb * 4 * Hp * b16 + 2 * Bb * Hp * b32
    out_blk = Bb * Cp * b32
    est = 2 * (x_blk + wts + out_blk) + scr
    vmem_limit = int(min(max(1.5 * est + (2 << 20), 16 << 20), 64 << 20))

    kernel = functools.partial(
        lstm_baseline_kernel,
        num_classes=C, seq_len=T, time_mask=(Tp != T), unroll=unroll)

    const2 = lambda b, t: (0, 0)   # weights: constant block index -> no re-DMA

    out = pl.pallas_call(
        kernel,
        out_shape=jax.ShapeDtypeStruct((Bp, Cp), jnp.float32),
        grid=(num_batch_shards, n_t),
        in_specs=[
            pl.BlockSpec((Tc, Bb, I), lambda b, t: (t, b, 0)),   # x chunk
            pl.BlockSpec((I, 4 * Hp), const2),                   # W_ih
            pl.BlockSpec((Hp, 4 * Hp), const2),                  # W_hh
            pl.BlockSpec((1, 4 * Hp), const2),                   # bias
            pl.BlockSpec((Hp, H1p), const2),                     # w1
            pl.BlockSpec((1, H1p), const2),                      # b1
            pl.BlockSpec((H1p, H1p), const2),                    # w2
            pl.BlockSpec((1, H1p), const2),                      # b2
            pl.BlockSpec((H1p, Cp), const2),                     # w3
            pl.BlockSpec((1, Cp), const2),                       # b3
        ],
        out_specs=pl.BlockSpec((Bb, Cp), lambda b, t: (b, 0)),
        scratch_shapes=[
            pltpu.VMEM((Tc, Bb, 4 * Hp), jnp.bfloat16),   # hoisted x-projection
            pltpu.VMEM((Bb, Hp), jnp.float32),            # persistent h
            pltpu.VMEM((Bb, Hp), jnp.float32),            # persistent c
        ],
        compiler_params=pltpu.CompilerParams(
            dimension_semantics=("parallel", "arbitrary"),
            vmem_limit_bytes=vmem_limit),
    )(x_tm, wih, whh, bias, w1, b1, w2, b2, w3, b3)

    return out[:B, :C]


def reference_forward(x, params):
    """Pure-JAX f32 reference of the PyTorch module (gate order i,f,g,o)."""
    B, T, I = x.shape
    H = params["w_hh"].shape[1]
    b = params["b_ih"] + params["b_hh"]
    h = jnp.zeros((B, H), jnp.float32)
    c = jnp.zeros((B, H), jnp.float32)
    for t in range(T):
        g = x[:, t, :] @ params["w_ih"].T + h @ params["w_hh"].T + b
        i_g = jax.nn.sigmoid(g[:, 0:H])
        f_g = jax.nn.sigmoid(g[:, H:2 * H])
        g_g = jnp.tanh(g[:, 2 * H:3 * H])
        o_g = jax.nn.sigmoid(g[:, 3 * H:4 * H])
        c = f_g * c + i_g * g_g
        h = o_g * jnp.tanh(c)
    y = jnp.maximum(h @ params["w1"].T + params["b1"], 0.0)
    y = jnp.maximum(y @ params["w2"].T + params["b2"], 0.0)
    z = y @ params["w3"].T + params["b3"]
    return jax.nn.log_softmax(z, axis=-1)


def init_params(key, input_size, hidden_size, num_classes):
    """Deterministic params mimicking PyTorch default uniform(-1/sqrt(fan), 1/sqrt(fan))."""
    ks = jax.random.split(key, 10)
    kl = 1.0 / jnp.sqrt(hidden_size)
    half = hidden_size // 2

    def u(k, shape, bound):
        return jax.random.uniform(k, shape, jnp.float32, -bound, bound)

    return {
        "w_ih": u(ks[0], (4 * hidden_size, input_size), kl),
        "w_hh": u(ks[1], (4 * hidden_size, hidden_size), kl),
        "b_ih": u(ks[2], (4 * hidden_size,), kl),
        "b_hh": u(ks[3], (4 * hidden_size,), kl),
        "w1": u(ks[4], (half, hidden_size), 1.0 / jnp.sqrt(hidden_size)),
        "b1": u(ks[5], (half,), 1.0 / jnp.sqrt(hidden_size)),
        "w2": u(ks[6], (half, half), 1.0 / jnp.sqrt(half)),
        "b2": u(ks[7], (half,), 1.0 / jnp.sqrt(half)),
        "w3": u(ks[8], (num_classes, half), 1.0 / jnp.sqrt(half)),
        "b3": u(ks[9], (num_classes,), 1.0 / jnp.sqrt(half)),
    }


if __name__ == "__main__":
    # Small shapes: batch=2, seq=8, input_size=16, hidden=32, num_classes=10
    B, T, I, H, C = 2, 8, 16, 32, 10

    key = jax.random.PRNGKey(0)
    k_x, k_p = jax.random.split(key)
    x = jax.random.normal(k_x, (B, T, I), jnp.float32)
    params = init_params(k_p, I, H, C)

    out = lstm_for_baseline_forward(x, params)
    out = jax.block_until_ready(out)

    assert out.shape == (B, C) and out.dtype == jnp.float32
    # log_softmax rows should sum (in prob space) to ~1 and be finite.
    assert jnp.allclose(jnp.sum(jnp.exp(out), axis=-1), 1.0, atol=1e-3)
    assert bool(jnp.all(jnp.isfinite(out)))
    # Loose tolerance: bf16 matmul operands with f32 accumulation.
    ref = reference_forward(x, params)
    err = float(jnp.max(jnp.abs(out - ref)))
    assert err < 0.1, f"max abs error vs f32 reference: {err}"
    print("KERNEL_OK")
</pallas_src>

<mosaic_0001>
module attributes {stable_mosaic.version = 11 : i64} {
  func.func @lstm_baseline_kernel(%arg0: i32, %arg1: i32, %arg2: memref<8x8x16xbf16, #tpu.memory_space<vmem>>, %arg3: memref<16x512xbf16, #tpu.memory_space<vmem>>, %arg4: memref<128x512xbf16, #tpu.memory_space<vmem>>, %arg5: memref<1x512xf32, #tpu.memory_space<vmem>>, %arg6: memref<128x128xbf16, #tpu.memory_space<vmem>>, %arg7: memref<1x128xf32, #tpu.memory_space<vmem>>, %arg8: memref<128x128xbf16, #tpu.memory_space<vmem>>, %arg9: memref<1x128xf32, #tpu.memory_space<vmem>>, %arg10: memref<128x128xbf16, #tpu.memory_space<vmem>>, %arg11: memref<1x128xf32, #tpu.memory_space<vmem>>, %arg12: memref<8x128xf32, #tpu.memory_space<vmem>>, %arg13: memref<8x8x512xbf16, #tpu.memory_space<vmem>>, %arg14: memref<8x128xf32, #tpu.memory_space<vmem>>, %arg15: memref<8x128xf32, #tpu.memory_space<vmem>>) attributes {dimension_semantics = [#tpu.dimension_semantics<parallel>, #tpu.dimension_semantics<arbitrary>], iteration_bounds = array<i64: 1, 1>, scalar_prefetch = 0 : i64, scratch_operands = 3 : i64, tpu.core_type = #tpu.core_type<tc>, window_params = [{transform_indices = @transform_0, window_bounds = array<i64: 8, 8, 16>}, {pipeline_mode = #tpu.pipeline_mode<synchronous>, transform_indices = @transform_1, window_bounds = array<i64: 16, 512>}, {pipeline_mode = #tpu.pipeline_mode<synchronous>, transform_indices = @transform_2, window_bounds = array<i64: 128, 512>}, {pipeline_mode = #tpu.pipeline_mode<synchronous>, transform_indices = @transform_3, window_bounds = array<i64: 1, 512>}, {pipeline_mode = #tpu.pipeline_mode<synchronous>, transform_indices = @transform_4, window_bounds = array<i64: 128, 128>}, {pipeline_mode = #tpu.pipeline_mode<synchronous>, transform_indices = @transform_5, window_bounds = array<i64: 1, 128>}, {pipeline_mode = #tpu.pipeline_mode<synchronous>, transform_indices = @transform_6, window_bounds = array<i64: 128, 128>}, {pipeline_mode = #tpu.pipeline_mode<synchronous>, transform_indices = @transform_7, window_bounds = array<i64: 1, 128>}, {pipeline_mode = #tpu.pipeline_mode<synchronous>, transform_indices = @transform_8, window_bounds = array<i64: 128, 128>}, {pipeline_mode = #tpu.pipeline_mode<synchronous>, transform_indices = @transform_9, window_bounds = array<i64: 1, 128>}, {transform_indices = @transform_10, window_bounds = array<i64: 8, 128>}]} {
    %c0_i32 = arith.constant 0 : i32
    %0 = arith.cmpi eq, %arg1, %c0_i32 : i32
    %1 = arith.extui %0 : i1 to i32
    %c0_i32_0 = arith.constant 0 : i32
    %2 = arith.cmpi ne, %1, %c0_i32_0 : i32
    scf.if %2 {
      %cst_71 = arith.constant 0.000000e+00 : f32
      %291 = vector.broadcast %cst_71 : f32 to vector<8x128xf32>
      %c0_72 = arith.constant 0 : index
      %c0_73 = arith.constant 0 : index
      %292 = vector.load %arg14[%c0_72, %c0_73] : memref<8x128xf32, #tpu.memory_space<vmem>>, vector<8x128xf32>
      tpu.vector_store %arg14[%c0_72, %c0_73], %291 {strides = array<i32>} : memref<8x128xf32, #tpu.memory_space<vmem>>, vector<8x128xf32>,
      %cst_74 = arith.constant 0.000000e+00 : f32
      %293 = vector.broadcast %cst_74 : f32 to vector<8x128xf32>
      %c0_75 = arith.constant 0 : index
      %c0_76 = arith.constant 0 : index
      %294 = vector.load %arg15[%c0_75, %c0_76] : memref<8x128xf32, #tpu.memory_space<vmem>>, vector<8x128xf32>
      tpu.vector_store %arg15[%c0_75, %c0_76], %293 {strides = array<i32>} : memref<8x128xf32, #tpu.memory_space<vmem>>, vector<8x128xf32>,
    } else {
    }
    %c0 = arith.constant 0 : index
    %c0_1 = arith.constant 0 : index
    %c0_2 = arith.constant 0 : index
    %3 = vector.load %arg2[%c0, %c0_1, %c0_2] : memref<8x8x16xbf16, #tpu.memory_space<vmem>>, vector<8x8x16xbf16>
    %4 = vector.shape_cast %3 : vector<8x8x16xbf16> to vector<64x16xbf16>
    %c0_3 = arith.constant 0 : index
    %c0_4 = arith.constant 0 : index
    %5 = vector.load %arg3[%c0_3, %c0_4] : memref<16x512xbf16, #tpu.memory_space<vmem>>, vector<16x512xbf16>
    %cst = arith.constant dense<0.000000e+00> : vector<64x512xf32>
    %6 = tpu.matmul %4, %5, %cst {dimension_numbers = #tpu.dot_dimension_numbers<[1], [0], [0], [1], [0, 0, 1, 1], [], []>} : vector<64x16xbf16>, vector<16x512xbf16>, vector<64x512xf32> -> vector<64x512xf32>
    %7 = arith.truncf %6 : vector<64x512xf32> to vector<64x512xbf16>
    %8 = vector.shape_cast %7 : vector<64x512xbf16> to vector<8x8x512xbf16>
    %c0_5 = arith.constant 0 : index
    %c0_6 = arith.constant 0 : index
    %c0_7 = arith.constant 0 : index
    %9 = vector.load %arg13[%c0_5, %c0_6, %c0_7] : memref<8x8x512xbf16, #tpu.memory_space<vmem>>, vector<8x8x512xbf16>
    tpu.vector_store %arg13[%c0_5, %c0_6, %c0_7], %8 {strides = array<i32>} : memref<8x8x512xbf16, #tpu.memory_space<vmem>>, vector<8x8x512xbf16>,
    %c0_8 = arith.constant 0 : index
    %c0_9 = arith.constant 0 : index
    %10 = vector.load %arg4[%c0_8, %c0_9] : memref<128x512xbf16, #tpu.memory_space<vmem>>, vector<128x512xbf16>
    %c0_10 = arith.constant 0 : index
    %c0_11 = arith.constant 0 : index
    %11 = vector.load %arg5[%c0_10, %c0_11] : memref<1x512xf32, #tpu.memory_space<vmem>>, vector<1x512xf32>
    %c0_12 = arith.constant 0 : index
    %c0_13 = arith.constant 0 : index
    %12 = vector.load %arg14[%c0_12, %c0_13] : memref<8x128xf32, #tpu.memory_space<vmem>>, vector<8x128xf32>
    %c0_14 = arith.constant 0 : index
    %c0_15 = arith.constant 0 : index
    %13 = vector.load %arg15[%c0_14, %c0_15] : memref<8x128xf32, #tpu.memory_space<vmem>>, vector<8x128xf32>
    %c0_i32_16 = arith.constant 0 : i32
    %14 = arith.index_cast %c0_i32_16 : i32 to index
    %c0_17 = arith.constant 0 : index
    %c0_18 = arith.constant 0 : index
    %15 = vector.load %arg13[%14, %c0_17, %c0_18] : memref<8x8x512xbf16, #tpu.memory_space<vmem>>, vector<1x8x512xbf16>
    %16 = vector.shape_cast %15 : vector<1x8x512xbf16> to vector<8x512xbf16>
    %17 = arith.extf %16 : vector<8x512xbf16> to vector<8x512xf32>
    %18 = vector.broadcast %11 : vector<1x512xf32> to vector<8x512xf32>
    %19 = arith.addf %17, %18 : vector<8x512xf32>
    %20 = arith.truncf %12 : vector<8x128xf32> to vector<8x128xbf16>
    %cst_19 = arith.constant dense<0.000000e+00> : vector<8x512xf32>
    %21 = tpu.matmul %20, %10, %cst_19 {dimension_numbers = #tpu.dot_dimension_numbers<[1], [0], [0], [1], [0, 0, 1, 1], [], []>} : vector<8x128xbf16>, vector<128x512xbf16>, vector<8x512xf32> -> vector<8x512xf32>
    %22 = arith.addf %19, %21 : vector<8x512xf32>
    %23 = vector.extract_strided_slice %22 {offsets = [0, 0], sizes = [8, 128], strides = [1, 1]} : vector<8x512xf32> to vector<8x128xf32>
    %24 = arith.negf %23 : vector<8x128xf32>
    %25 = math.exp %24 : vector<8x128xf32>
    %cst_20 = arith.constant 1.000000e+00 : f32
    %26 = vector.broadcast %cst_20 : f32 to vector<8x128xf32>
    %27 = arith.addf %26, %25 : vector<8x128xf32>
    %28 = arith.divf %26, %27 : vector<8x128xf32>
    %29 = vector.extract_strided_slice %22 {offsets = [0, 128], sizes = [8, 128], strides = [1, 1]} : vector<8x512xf32> to vector<8x128xf32>
    %30 = arith.negf %29 : vector<8x128xf32>
    %31 = math.exp %30 : vector<8x128xf32>
    %cst_21 = arith.constant 1.000000e+00 : f32
    %32 = vector.broadcast %cst_21 : f32 to vector<8x128xf32>
    %33 = arith.addf %32, %31 : vector<8x128xf32>
    %34 = arith.divf %32, %33 : vector<8x128xf32>
    %35 = vector.extract_strided_slice %22 {offsets = [0, 256], sizes = [8, 128], strides = [1, 1]} : vector<8x512xf32> to vector<8x128xf32>
    %36 = math.tanh %35 : vector<8x128xf32>
    %37 = vector.extract_strided_slice %22 {offsets = [0, 384], sizes = [8, 128], strides = [1, 1]} : vector<8x512xf32> to vector<8x128xf32>
    %38 = arith.negf %37 : vector<8x128xf32>
    %39 = math.exp %38 : vector<8x128xf32>
    %cst_22 = arith.constant 1.000000e+00 : f32
    %40 = vector.broadcast %cst_22 : f32 to vector<8x128xf32>
    %41 = arith.addf %40, %39 : vector<8x128xf32>
    %42 = arith.divf %40, %41 : vector<8x128xf32>
    %43 = arith.mulf %34, %13 : vector<8x128xf32>
    %44 = arith.mulf %28, %36 : vector<8x128xf32>
    %45 = arith.addf %43, %44 : vector<8x128xf32>
    %46 = math.tanh %45 : vector<8x128xf32>
    %47 = arith.mulf %42, %46 : vector<8x128xf32>
    %c1_i32 = arith.constant 1 : i32
    %48 = arith.index_cast %c1_i32 : i32 to index
    %c0_23 = arith.constant 0 : index
    %c0_24 = arith.constant 0 : index
    %49 = vector.load %arg13[%48, %c0_23, %c0_24] : memref<8x8x512xbf16, #tpu.memory_space<vmem>>, vector<1x8x512xbf16>
    %50 = vector.shape_cast %49 : vector<1x8x512xbf16> to vector<8x512xbf16>
    %51 = arith.extf %50 : vector<8x512xbf16> to vector<8x512xf32>
    %52 = vector.broadcast %11 : vector<1x512xf32> to vector<8x512xf32>
    %53 = arith.addf %51, %52 : vector<8x512xf32>
    %54 = arith.truncf %47 : vector<8x128xf32> to vector<8x128xbf16>
    %cst_25 = arith.constant dense<0.000000e+00> : vector<8x512xf32>
    %55 = tpu.matmul %54, %10, %cst_25 {dimension_numbers = #tpu.dot_dimension_numbers<[1], [0], [0], [1], [0, 0, 1, 1], [], []>} : vector<8x128xbf16>, vector<128x512xbf16>, vector<8x512xf32> -> vector<8x512xf32>
    %56 = arith.addf %53, %55 : vector<8x512xf32>
    %57 = vector.extract_strided_slice %56 {offsets = [0, 0], sizes = [8, 128], strides = [1, 1]} : vector<8x512xf32> to vector<8x128xf32>
    %58 = arith.negf %57 : vector<8x128xf32>
    %59 = math.exp %58 : vector<8x128xf32>
    %cst_26 = arith.constant 1.000000e+00 : f32
    %60 = vector.broadcast %cst_26 : f32 to vector<8x128xf32>
    %61 = arith.addf %60, %59 : vector<8x128xf32>
    %62 = arith.divf %60, %61 : vector<8x128xf32>
    %63 = vector.extract_strided_slice %56 {offsets = [0, 128], sizes = [8, 128], strides = [1, 1]} : vector<8x512xf32> to vector<8x128xf32>
    %64 = arith.negf %63 : vector<8x128xf32>
    %65 = math.exp %64 : vector<8x128xf32>
    %cst_27 = arith.constant 1.000000e+00 : f32
    %66 = vector.broadcast %cst_27 : f32 to vector<8x128xf32>
    %67 = arith.addf %66, %65 : vector<8x128xf32>
    %68 = arith.divf %66, %67 : vector<8x128xf32>
    %69 = vector.extract_strided_slice %56 {offsets = [0, 256], sizes = [8, 128], strides = [1, 1]} : vector<8x512xf32> to vector<8x128xf32>
    %70 = math.tanh %69 : vector<8x128xf32>
    %71 = vector.extract_strided_slice %56 {offsets = [0, 384], sizes = [8, 128], strides = [1, 1]} : vector<8x512xf32> to vector<8x128xf32>
    %72 = arith.negf %71 : vector<8x128xf32>
    %73 = math.exp %72 : vector<8x128xf32>
    %cst_28 = arith.constant 1.000000e+00 : f32
    %74 = vector.broadcast %cst_28 : f32 to vector<8x128xf32>
    %75 = arith.addf %74, %73 : vector<8x128xf32>
    %76 = arith.divf %74, %75 : vector<8x128xf32>
    %77 = arith.mulf %68, %45 : vector<8x128xf32>
    %78 = arith.mulf %62, %70 : vector<8x128xf32>
    %79 = arith.addf %77, %78 : vector<8x128xf32>
    %80 = math.tanh %79 : vector<8x128xf32>
    %81 = arith.mulf %76, %80 : vector<8x128xf32>
    %c2_i32 = arith.constant 2 : i32
    %82 = arith.index_cast %c2_i32 : i32 to index
    %c0_29 = arith.constant 0 : index
    %c0_30 = arith.constant 0 : index
    %83 = vector.load %arg13[%82, %c0_29, %c0_30] : memref<8x8x512xbf16, #tpu.memory_space<vmem>>, vector<1x8x512xbf16>
    %84 = vector.shape_cast %83 : vector<1x8x512xbf16> to vector<8x512xbf16>
    %85 = arith.extf %84 : vector<8x512xbf16> to vector<8x512xf32>
    %86 = vector.broadcast %11 : vector<1x512xf32> to vector<8x512xf32>
    %87 = arith.addf %85, %86 : vector<8x512xf32>
    %88 = arith.truncf %81 : vector<8x128xf32> to vector<8x128xbf16>
    %cst_31 = arith.constant dense<0.000000e+00> : vector<8x512xf32>
    %89 = tpu.matmul %88, %10, %cst_31 {dimension_numbers = #tpu.dot_dimension_numbers<[1], [0], [0], [1], [0, 0, 1, 1], [], []>} : vector<8x128xbf16>, vector<128x512xbf16>, vector<8x512xf32> -> vector<8x512xf32>
    %90 = arith.addf %87, %89 : vector<8x512xf32>
    %91 = vector.extract_strided_slice %90 {offsets = [0, 0], sizes = [8, 128], strides = [1, 1]} : vector<8x512xf32> to vector<8x128xf32>
    %92 = arith.negf %91 : vector<8x128xf32>
    %93 = math.exp %92 : vector<8x128xf32>
    %cst_32 = arith.constant 1.000000e+00 : f32
    %94 = vector.broadcast %cst_32 : f32 to vector<8x128xf32>
    %95 = arith.addf %94, %93 : vector<8x128xf32>
    %96 = arith.divf %94, %95 : vector<8x128xf32>
    %97 = vector.extract_strided_slice %90 {offsets = [0, 128], sizes = [8, 128], strides = [1, 1]} : vector<8x512xf32> to vector<8x128xf32>
    %98 = arith.negf %97 : vector<8x128xf32>
    %99 = math.exp %98 : vector<8x128xf32>
    %cst_33 = arith.constant 1.000000e+00 : f32
    %100 = vector.broadcast %cst_33 : f32 to vector<8x128xf32>
    %101 = arith.addf %100, %99 : vector<8x128xf32>
    %102 = arith.divf %100, %101 : vector<8x128xf32>
    %103 = vector.extract_strided_slice %90 {offsets = [0, 256], sizes = [8, 128], strides = [1, 1]} : vector<8x512xf32> to vector<8x128xf32>
    %104 = math.tanh %103 : vector<8x128xf32>
    %105 = vector.extract_strided_slice %90 {offsets = [0, 384], sizes = [8, 128], strides = [1, 1]} : vector<8x512xf32> to vector<8x128xf32>
    %106 = arith.negf %105 : vector<8x128xf32>
    %107 = math.exp %106 : vector<8x128xf32>
    %cst_34 = arith.constant 1.000000e+00 : f32
    %108 = vector.broadcast %cst_34 : f32 to vector<8x128xf32>
    %109 = arith.addf %108, %107 : vector<8x128xf32>
    %110 = arith.divf %108, %109 : vector<8x128xf32>
    %111 = arith.mulf %102, %79 : vector<8x128xf32>
    %112 = arith.mulf %96, %104 : vector<8x128xf32>
    %113 = arith.addf %111, %112 : vector<8x128xf32>
    %114 = math.tanh %113 : vector<8x128xf32>
    %115 = arith.mulf %110, %114 : vector<8x128xf32>
    %c3_i32 = arith.constant 3 : i32
    %116 = arith.index_cast %c3_i32 : i32 to index
    %c0_35 = arith.constant 0 : index
    %c0_36 = arith.constant 0 : index
    %117 = vector.load %arg13[%116, %c0_35, %c0_36] : memref<8x8x512xbf16, #tpu.memory_space<vmem>>, vector<1x8x512xbf16>
    %118 = vector.shape_cast %117 : vector<1x8x512xbf16> to vector<8x512xbf16>
    %119 = arith.extf %118 : vector<8x512xbf16> to vector<8x512xf32>
    %120 = vector.broadcast %11 : vector<1x512xf32> to vector<8x512xf32>
    %121 = arith.addf %119, %120 : vector<8x512xf32>
    %122 = arith.truncf %115 : vector<8x128xf32> to vector<8x128xbf16>
    %cst_37 = arith.constant dense<0.000000e+00> : vector<8x512xf32>
    %123 = tpu.matmul %122, %10, %cst_37 {dimension_numbers = #tpu.dot_dimension_numbers<[1], [0], [0], [1], [0, 0, 1, 1], [], []>} : vector<8x128xbf16>, vector<128x512xbf16>, vector<8x512xf32> -> vector<8x512xf32>
    %124 = arith.addf %121, %123 : vector<8x512xf32>
    %125 = vector.extract_strided_slice %124 {offsets = [0, 0], sizes = [8, 128], strides = [1, 1]} : vector<8x512xf32> to vector<8x128xf32>
    %126 = arith.negf %125 : vector<8x128xf32>
    %127 = math.exp %126 : vector<8x128xf32>
    %cst_38 = arith.constant 1.000000e+00 : f32
    %128 = vector.broadcast %cst_38 : f32 to vector<8x128xf32>
    %129 = arith.addf %128, %127 : vector<8x128xf32>
    %130 = arith.divf %128, %129 : vector<8x128xf32>
    %131 = vector.extract_strided_slice %124 {offsets = [0, 128], sizes = [8, 128], strides = [1, 1]} : vector<8x512xf32> to vector<8x128xf32>
    %132 = arith.negf %131 : vector<8x128xf32>
    %133 = math.exp %132 : vector<8x128xf32>
    %cst_39 = arith.constant 1.000000e+00 : f32
    %134 = vector.broadcast %cst_39 : f32 to vector<8x128xf32>
    %135 = arith.addf %134, %133 : vector<8x128xf32>
    %136 = arith.divf %134, %135 : vector<8x128xf32>
    %137 = vector.extract_strided_slice %124 {offsets = [0, 256], sizes = [8, 128], strides = [1, 1]} : vector<8x512xf32> to vector<8x128xf32>
    %138 = math.tanh %137 : vector<8x128xf32>
    %139 = vector.extract_strided_slice %124 {offsets = [0, 384], sizes = [8, 128], strides = [1, 1]} : vector<8x512xf32> to vector<8x128xf32>
    %140 = arith.negf %139 : vector<8x128xf32>
    %141 = math.exp %140 : vector<8x128xf32>
    %cst_40 = arith.constant 1.000000e+00 : f32
    %142 = vector.broadcast %cst_40 : f32 to vector<8x128xf32>
    %143 = arith.addf %142, %141 : vector<8x128xf32>
    %144 = arith.divf %142, %143 : vector<8x128xf32>
    %145 = arith.mulf %136, %113 : vector<8x128xf32>
    %146 = arith.mulf %130, %138 : vector<8x128xf32>
    %147 = arith.addf %145, %146 : vector<8x128xf32>
    %148 = math.tanh %147 : vector<8x128xf32>
    %149 = arith.mulf %144, %148 : vector<8x128xf32>
    %c4_i32 = arith.constant 4 : i32
    %150 = arith.index_cast %c4_i32 : i32 to index
    %c0_41 = arith.constant 0 : index
    %c0_42 = arith.constant 0 : index
    %151 = vector.load %arg13[%150, %c0_41, %c0_42] : memref<8x8x512xbf16, #tpu.memory_space<vmem>>, vector<1x8x512xbf16>
    %152 = vector.shape_cast %151 : vector<1x8x512xbf16> to vector<8x512xbf16>
    %153 = arith.extf %152 : vector<8x512xbf16> to vector<8x512xf32>
    %154 = vector.broadcast %11 : vector<1x512xf32> to vector<8x512xf32>
    %155 = arith.addf %153, %154 : vector<8x512xf32>
    %156 = arith.truncf %149 : vector<8x128xf32> to vector<8x128xbf16>
    %cst_43 = arith.constant dense<0.000000e+00> : vector<8x512xf32>
    %157 = tpu.matmul %156, %10, %cst_43 {dimension_numbers = #tpu.dot_dimension_numbers<[1], [0], [0], [1], [0, 0, 1, 1], [], []>} : vector<8x128xbf16>, vector<128x512xbf16>, vector<8x512xf32> -> vector<8x512xf32>
    %158 = arith.addf %155, %157 : vector<8x512xf32>
    %159 = vector.extract_strided_slice %158 {offsets = [0, 0], sizes = [8, 128], strides = [1, 1]} : vector<8x512xf32> to vector<8x128xf32>
    %160 = arith.negf %159 : vector<8x128xf32>
    %161 = math.exp %160 : vector<8x128xf32>
    %cst_44 = arith.constant 1.000000e+00 : f32
    %162 = vector.broadcast %cst_44 : f32 to vector<8x128xf32>
    %163 = arith.addf %162, %161 : vector<8x128xf32>
    %164 = arith.divf %162, %163 : vector<8x128xf32>
    %165 = vector.extract_strided_slice %158 {offsets = [0, 128], sizes = [8, 128], strides = [1, 1]} : vector<8x512xf32> to vector<8x128xf32>
    %166 = arith.negf %165 : vector<8x128xf32>
    %167 = math.exp %166 : vector<8x128xf32>
    %cst_45 = arith.constant 1.000000e+00 : f32
    %168 = vector.broadcast %cst_45 : f32 to vector<8x128xf32>
    %169 = arith.addf %168, %167 : vector<8x128xf32>
    %170 = arith.divf %168, %169 : vector<8x128xf32>
    %171 = vector.extract_strided_slice %158 {offsets = [0, 256], sizes = [8, 128], strides = [1, 1]} : vector<8x512xf32> to vector<8x128xf32>
    %172 = math.tanh %171 : vector<8x128xf32>
    %173 = vector.extract_strided_slice %158 {offsets = [0, 384], sizes = [8, 128], strides = [1, 1]} : vector<8x512xf32> to vector<8x128xf32>
    %174 = arith.negf %173 : vector<8x128xf32>
    %175 = math.exp %174 : vector<8x128xf32>
    %cst_46 = arith.constant 1.000000e+00 : f32
    %176 = vector.broadcast %cst_46 : f32 to vector<8x128xf32>
    %177 = arith.addf %176, %175 : vector<8x128xf32>
    %178 = arith.divf %176, %177 : vector<8x128xf32>
    %179 = arith.mulf %170, %147 : vector<8x128xf32>
    %180 = arith.mulf %164, %172 : vector<8x128xf32>
    %181 = arith.addf %179, %180 : vector<8x128xf32>
    %182 = math.tanh %181 : vector<8x128xf32>
    %183 = arith.mulf %178, %182 : vector<8x128xf32>
    %c5_i32 = arith.constant 5 : i32
    %184 = arith.index_cast %c5_i32 : i32 to index
    %c0_47 = arith.constant 0 : index
    %c0_48 = arith.constant 0 : index
    %185 = vector.load %arg13[%184, %c0_47, %c0_48] : memref<8x8x512xbf16, #tpu.memory_space<vmem>>, vector<1x8x512xbf16>
    %186 = vector.shape_cast %185 : vector<1x8x512xbf16> to vector<8x512xbf16>
    %187 = arith.extf %186 : vector<8x512xbf16> to vector<8x512xf32>
    %188 = vector.broadcast %11 : vector<1x512xf32> to vector<8x512xf32>
    %189 = arith.addf %187, %188 : vector<8x512xf32>
    %190 = arith.truncf %183 : vector<8x128xf32> to vector<8x128xbf16>
    %cst_49 = arith.constant dense<0.000000e+00> : vector<8x512xf32>
    %191 = tpu.matmul %190, %10, %cst_49 {dimension_numbers = #tpu.dot_dimension_numbers<[1], [0], [0], [1], [0, 0, 1, 1], [], []>} : vector<8x128xbf16>, vector<128x512xbf16>, vector<8x512xf32> -> vector<8x512xf32>
    %192 = arith.addf %189, %191 : vector<8x512xf32>
    %193 = vector.extract_strided_slice %192 {offsets = [0, 0], sizes = [8, 128], strides = [1, 1]} : vector<8x512xf32> to vector<8x128xf32>
    %194 = arith.negf %193 : vector<8x128xf32>
    %195 = math.exp %194 : vector<8x128xf32>
    %cst_50 = arith.constant 1.000000e+00 : f32
    %196 = vector.broadcast %cst_50 : f32 to vector<8x128xf32>
    %197 = arith.addf %196, %195 : vector<8x128xf32>
    %198 = arith.divf %196, %197 : vector<8x128xf32>
    %199 = vector.extract_strided_slice %192 {offsets = [0, 128], sizes = [8, 128], strides = [1, 1]} : vector<8x512xf32> to vector<8x128xf32>
    %200 = arith.negf %199 : vector<8x128xf32>
    %201 = math.exp %200 : vector<8x128xf32>
    %cst_51 = arith.constant 1.000000e+00 : f32
    %202 = vector.broadcast %cst_51 : f32 to vector<8x128xf32>
    %203 = arith.addf %202, %201 : vector<8x128xf32>
    %204 = arith.divf %202, %203 : vector<8x128xf32>
    %205 = vector.extract_strided_slice %192 {offsets = [0, 256], sizes = [8, 128], strides = [1, 1]} : vector<8x512xf32> to vector<8x128xf32>
    %206 = math.tanh %205 : vector<8x128xf32>
    %207 = vector.extract_strided_slice %192 {offsets = [0, 384], sizes = [8, 128], strides = [1, 1]} : vector<8x512xf32> to vector<8x128xf32>
    %208 = arith.negf %207 : vector<8x128xf32>
    %209 = math.exp %208 : vector<8x128xf32>
    %cst_52 = arith.constant 1.000000e+00 : f32
    %210 = vector.broadcast %cst_52 : f32 to vector<8x128xf32>
    %211 = arith.addf %210, %209 : vector<8x128xf32>
    %212 = arith.divf %210, %211 : vector<8x128xf32>
    %213 = arith.mulf %204, %181 : vector<8x128xf32>
    %214 = arith.mulf %198, %206 : vector<8x128xf32>
    %215 = arith.addf %213, %214 : vector<8x128xf32>
    %216 = math.tanh %215 : vector<8x128xf32>
    %217 = arith.mulf %212, %216 : vector<8x128xf32>
    %c6_i32 = arith.constant 6 : i32
    %218 = arith.index_cast %c6_i32 : i32 to index
    %c0_53 = arith.constant 0 : index
    %c0_54 = arith.constant 0 : index
    %219 = vector.load %arg13[%218, %c0_53, %c0_54] : memref<8x8x512xbf16, #tpu.memory_space<vmem>>, vector<1x8x512xbf16>
    %220 = vector.shape_cast %219 : vector<1x8x512xbf16> to vector<8x512xbf16>
    %221 = arith.extf %220 : vector<8x512xbf16> to vector<8x512xf32>
    %222 = vector.broadcast %11 : vector<1x512xf32> to vector<8x512xf32>
    %223 = arith.addf %221, %222 : vector<8x512xf32>
    %224 = arith.truncf %217 : vector<8x128xf32> to vector<8x128xbf16>
    %cst_55 = arith.constant dense<0.000000e+00> : vector<8x512xf32>
    %225 = tpu.matmul %224, %10, %cst_55 {dimension_numbers = #tpu.dot_dimension_numbers<[1], [0], [0], [1], [0, 0, 1, 1], [], []>} : vector<8x128xbf16>, vector<128x512xbf16>, vector<8x512xf32> -> vector<8x512xf32>
    %226 = arith.addf %223, %225 : vector<8x512xf32>
    %227 = vector.extract_strided_slice %226 {offsets = [0, 0], sizes = [8, 128], strides = [1, 1]} : vector<8x512xf32> to vector<8x128xf32>
    %228 = arith.negf %227 : vector<8x128xf32>
    %229 = math.exp %228 : vector<8x128xf32>
    %cst_56 = arith.constant 1.000000e+00 : f32
    %230 = vector.broadcast %cst_56 : f32 to vector<8x128xf32>
    %231 = arith.addf %230, %229 : vector<8x128xf32>
    %232 = arith.divf %230, %231 : vector<8x128xf32>
    %233 = vector.extract_strided_slice %226 {offsets = [0, 128], sizes = [8, 128], strides = [1, 1]} : vector<8x512xf32> to vector<8x128xf32>
    %234 = arith.negf %233 : vector<8x128xf32>
    %235 = math.exp %234 : vector<8x128xf32>
    %cst_57 = arith.constant 1.000000e+00 : f32
    %236 = vector.broadcast %cst_57 : f32 to vector<8x128xf32>
    %237 = arith.addf %236, %235 : vector<8x128xf32>
    %238 = arith.divf %236, %237 : vector<8x128xf32>
    %239 = vector.extract_strided_slice %226 {offsets = [0, 256], sizes = [8, 128], strides = [1, 1]} : vector<8x512xf32> to vector<8x128xf32>
    %240 = math.tanh %239 : vector<8x128xf32>
    %241 = vector.extract_strided_slice %226 {offsets = [0, 384], sizes = [8, 128], strides = [1, 1]} : vector<8x512xf32> to vector<8x128xf32>
    %242 = arith.negf %241 : vector<8x128xf32>
    %243 = math.exp %242 : vector<8x128xf32>
    %cst_58 = arith.constant 1.000000e+00 : f32
    %244 = vector.broadcast %cst_58 : f32 to vector<8x128xf32>
    %245 = arith.addf %244, %243 : vector<8x128xf32>
    %246 = arith.divf %244, %245 : vector<8x128xf32>
    %247 = arith.mulf %238, %215 : vector<8x128xf32>
    %248 = arith.mulf %232, %240 : vector<8x128xf32>
    %249 = arith.addf %247, %248 : vector<8x128xf32>
    %250 = math.tanh %249 : vector<8x128xf32>
    %251 = arith.mulf %246, %250 : vector<8x128xf32>
    %c7_i32 = arith.constant 7 : i32
    %252 = arith.index_cast %c7_i32 : i32 to index
    %c0_59 = arith.constant 0 : index
    %c0_60 = arith.constant 0 : index
    %253 = vector.load %arg13[%252, %c0_59, %c0_60] : memref<8x8x512xbf16, #tpu.memory_space<vmem>>, vector<1x8x512xbf16>
    %254 = vector.shape_cast %253 : vector<1x8x512xbf16> to vector<8x512xbf16>
    %255 = arith.extf %254 : vector<8x512xbf16> to vector<8x512xf32>
    %256 = vector.broadcast %11 : vector<1x512xf32> to vector<8x512xf32>
    %257 = arith.addf %255, %256 : vector<8x512xf32>
    %258 = arith.truncf %251 : vector<8x128xf32> to vector<8x128xbf16>
    %cst_61 = arith.constant dense<0.000000e+00> : vector<8x512xf32>
    %259 = tpu.matmul %258, %10, %cst_61 {dimension_numbers = #tpu.dot_dimension_numbers<[1], [0], [0], [1], [0, 0, 1, 1], [], []>} : vector<8x128xbf16>, vector<128x512xbf16>, vector<8x512xf32> -> vector<8x512xf32>
    %260 = arith.addf %257, %259 : vector<8x512xf32>
    %261 = vector.extract_strided_slice %260 {offsets = [0, 0], sizes = [8, 128], strides = [1, 1]} : vector<8x512xf32> to vector<8x128xf32>
    %262 = arith.negf %261 : vector<8x128xf32>
    %263 = math.exp %262 : vector<8x128xf32>
    %cst_62 = arith.constant 1.000000e+00 : f32
    %264 = vector.broadcast %cst_62 : f32 to vector<8x128xf32>
    %265 = arith.addf %264, %263 : vector<8x128xf32>
    %266 = arith.divf %264, %265 : vector<8x128xf32>
    %267 = vector.extract_strided_slice %260 {offsets = [0, 128], sizes = [8, 128], strides = [1, 1]} : vector<8x512xf32> to vector<8x128xf32>
    %268 = arith.negf %267 : vector<8x128xf32>
    %269 = math.exp %268 : vector<8x128xf32>
    %cst_63 = arith.constant 1.000000e+00 : f32
    %270 = vector.broadcast %cst_63 : f32 to vector<8x128xf32>
    %271 = arith.addf %270, %269 : vector<8x128xf32>
    %272 = arith.divf %270, %271 : vector<8x128xf32>
    %273 = vector.extract_strided_slice %260 {offsets = [0, 256], sizes = [8, 128], strides = [1, 1]} : vector<8x512xf32> to vector<8x128xf32>
    %274 = math.tanh %273 : vector<8x128xf32>
    %275 = vector.extract_strided_slice %260 {offsets = [0, 384], sizes = [8, 128], strides = [1, 1]} : vector<8x512xf32> to vector<8x128xf32>
    %276 = arith.negf %275 : vector<8x128xf32>
    %277 = math.exp %276 : vector<8x128xf32>
    %cst_64 = arith.constant 1.000000e+00 : f32
    %278 = vector.broadcast %cst_64 : f32 to vector<8x128xf32>
    %279 = arith.addf %278, %277 : vector<8x128xf32>
    %280 = arith.divf %278, %279 : vector<8x128xf32>
    %281 = arith.mulf %272, %249 : vector<8x128xf32>
    %282 = arith.mulf %266, %274 : vector<8x128xf32>
    %283 = arith.addf %281, %282 : vector<8x128xf32>
    %284 = math.tanh %283 : vector<8x128xf32>
    %285 = arith.mulf %280, %284 : vector<8x128xf32>
    %c8_i32 = arith.constant 8 : i32
    %c0_65 = arith.constant 0 : index
    %c0_66 = arith.constant 0 : index
    %286 = vector.load %arg14[%c0_65, %c0_66] : memref<8x128xf32, #tpu.memory_space<vmem>>, vector<8x128xf32>
    tpu.vector_store %arg14[%c0_65, %c0_66], %285 {strides = array<i32>} : memref<8x128xf32, #tpu.memory_space<vmem>>, vector<8x128xf32>,
    %c0_67 = arith.constant 0 : index
    %c0_68 = arith.constant 0 : index
    %287 = vector.load %arg15[%c0_67, %c0_68] : memref<8x128xf32, #tpu.memory_space<vmem>>, vector<8x128xf32>
    tpu.vector_store %arg15[%c0_67, %c0_68], %283 {strides = array<i32>} : memref<8x128xf32, #tpu.memory_space<vmem>>, vector<8x128xf32>,
    %c0_i32_69 = arith.constant 0 : i32
    %288 = arith.cmpi eq, %arg1, %c0_i32_69 : i32
    %289 = arith.extui %288 : i1 to i32
    %c0_i32_70 = arith.constant 0 : i32
    %290 = arith.cmpi ne, %289, %c0_i32_70 : i32
    scf.if %290 {
      %291 = arith.truncf %285 : vector<8x128xf32> to vector<8x128xbf16>
      %c0_71 = arith.constant 0 : index
      %c0_72 = arith.constant 0 : index
      %292 = vector.load %arg6[%c0_71, %c0_72] : memref<128x128xbf16, #tpu.memory_space<vmem>>, vector<128x128xbf16>
      %cst_73 = arith.constant dense<0.000000e+00> : vector<8x128xf32>
      %293 = tpu.matmul %291, %292, %cst_73 {dimension_numbers = #tpu.dot_dimension_numbers<[1], [0], [0], [1], [0, 0, 1, 1], [], []>} : vector<8x128xbf16>, vector<128x128xbf16>, vector<8x128xf32> -> vector<8x128xf32>
      %c0_74 = arith.constant 0 : index
      %c0_75 = arith.constant 0 : index
      %294 = vector.load %arg7[%c0_74, %c0_75] : memref<1x128xf32, #tpu.memory_space<vmem>>, vector<1x128xf32>
      %295 = vector.broadcast %294 : vector<1x128xf32> to vector<8x128xf32>
      %296 = arith.addf %293, %295 : vector<8x128xf32>
      %cst_76 = arith.constant 0.000000e+00 : f32
      %297 = vector.broadcast %cst_76 : f32 to vector<8x128xf32>
      %298 = arith.maximumf %296, %297 : vector<8x128xf32>
      %299 = arith.truncf %298 : vector<8x128xf32> to vector<8x128xbf16>
      %c0_77 = arith.constant 0 : index
      %c0_78 = arith.constant 0 : index
      %300 = vector.load %arg8[%c0_77, %c0_78] : memref<128x128xbf16, #tpu.memory_space<vmem>>, vector<128x128xbf16>
      %cst_79 = arith.constant dense<0.000000e+00> : vector<8x128xf32>
      %301 = tpu.matmul %299, %300, %cst_79 {dimension_numbers = #tpu.dot_dimension_numbers<[1], [0], [0], [1], [0, 0, 1, 1], [], []>} : vector<8x128xbf16>, vector<128x128xbf16>, vector<8x128xf32> -> vector<8x128xf32>
      %c0_80 = arith.constant 0 : index
      %c0_81 = arith.constant 0 : index
      %302 = vector.load %arg9[%c0_80, %c0_81] : memref<1x128xf32, #tpu.memory_space<vmem>>, vector<1x128xf32>
      %303 = vector.broadcast %302 : vector<1x128xf32> to vector<8x128xf32>
      %304 = arith.addf %301, %303 : vector<8x128xf32>
      %cst_82 = arith.constant 0.000000e+00 : f32
      %305 = vector.broadcast %cst_82 : f32 to vector<8x128xf32>
      %306 = arith.maximumf %304, %305 : vector<8x128xf32>
      %307 = arith.truncf %306 : vector<8x128xf32> to vector<8x128xbf16>
      %c0_83 = arith.constant 0 : index
      %c0_84 = arith.constant 0 : index
      %308 = vector.load %arg10[%c0_83, %c0_84] : memref<128x128xbf16, #tpu.memory_space<vmem>>, vector<128x128xbf16>
      %cst_85 = arith.constant dense<0.000000e+00> : vector<8x128xf32>
      %309 = tpu.matmul %307, %308, %cst_85 {dimension_numbers = #tpu.dot_dimension_numbers<[1], [0], [0], [1], [0, 0, 1, 1], [], []>} : vector<8x128xbf16>, vector<128x128xbf16>, vector<8x128xf32> -> vector<8x128xf32>
      %c0_86 = arith.constant 0 : index
      %c0_87 = arith.constant 0 : index
      %310 = vector.load %arg11[%c0_86, %c0_87] : memref<1x128xf32, #tpu.memory_space<vmem>>, vector<1x128xf32>
      %311 = vector.broadcast %310 : vector<1x128xf32> to vector<8x128xf32>
      %312 = arith.addf %309, %311 : vector<8x128xf32>
      %313 = tpu.iota {dimensions = array<i32: 1>} : vector<8x128xi32>
      %c10_i32 = arith.constant 10 : i32
      %314 = vector.broadcast %c10_i32 : i32 to vector<8x128xi32>
      %315 = arith.cmpi slt, %313, %314 : vector<8x128xi32>
      %cst_88 = arith.constant -1.000000e+30 : f32
      %316 = vector.broadcast %cst_88 : f32 to vector<8x128xf32>
      %317 = arith.select %315, %312, %316 : vector<8x128xi1>, vector<8x128xf32>
      %cst_89 = arith.constant dense<0xFF800000> : vector<8xf32>
      %318 = vector.multi_reduction <maximumf>, %317, %cst_89 [1] : vector<8x128xf32> to vector<8xf32>
      %319 = vector.shape_cast %318 : vector<8xf32> to vector<8x1xf32>
      %320 = vector.broadcast %319 : vector<8x1xf32> to vector<8x128xf32>
      %321 = arith.subf %317, %320 : vector<8x128xf32>
      %322 = math.exp %321 : vector<8x128xf32>
      %cst_90 = arith.constant dense<0.000000e+00> : vector<8xf32>
      %323 = vector.multi_reduction <add>, %322, %cst_90 [1] : vector<8x128xf32> to vector<8xf32>
      %324 = vector.shape_cast %323 : vector<8xf32> to vector<8x1xf32>
      %325 = math.log %324 : vector<8x1xf32>
      %326 = vector.broadcast %325 : vector<8x1xf32> to vector<8x128xf32>
      %327 = arith.subf %321, %326 : vector<8x128xf32>
      %c0_91 = arith.constant 0 : index
      %c0_92 = arith.constant 0 : index
      %328 = vector.load %arg12[%c0_91, %c0_92] : memref<8x128xf32, #tpu.memory_space<vmem>>, vector<8x128xf32>
      tpu.vector_store %arg12[%c0_91, %c0_92], %327 {strides = array<i32>} : memref<8x128xf32, #tpu.memory_space<vmem>>, vector<8x128xf32>,
    } else {
    }
    return
  }
  func.func @transform_0(%arg0: i32, %arg1: i32) -> (i32, i32, i32) {
    %c0_i32 = arith.constant 0 : i32
    %c0_i32_0 = arith.constant 0 : i32
    return %arg1, %arg0, %c0_i32 : i32, i32, i32
  }
  func.func @transform_1(%arg0: i32, %arg1: i32) -> (i32, i32) {
    %c0_i32 = arith.constant 0 : i32
    %c0_i32_0 = arith.constant 0 : i32
    %c0_i32_1 = arith.constant 0 : i32
    return %c0_i32, %c0_i32_0 : i32, i32
  }
  func.func @transform_2(%arg0: i32, %arg1: i32) -> (i32, i32) {
    %c0_i32 = arith.constant 0 : i32
    %c0_i32_0 = arith.constant 0 : i32
    %c0_i32_1 = arith.constant 0 : i32
    return %c0_i32, %c0_i32_0 : i32, i32
  }
  func.func @transform_3(%arg0: i32, %arg1: i32) -> (i32, i32) {
    %c0_i32 = arith.constant 0 : i32
    %c0_i32_0 = arith.constant 0 : i32
    %c0_i32_1 = arith.constant 0 : i32
    return %c0_i32, %c0_i32_0 : i32, i32
  }
  func.func @transform_4(%arg0: i32, %arg1: i32) -> (i32, i32) {
    %c0_i32 = arith.constant 0 : i32
    %c0_i32_0 = arith.constant 0 : i32
    %c0_i32_1 = arith.constant 0 : i32
    return %c0_i32, %c0_i32_0 : i32, i32
  }
  func.func @transform_5(%arg0: i32, %arg1: i32) -> (i32, i32) {
    %c0_i32 = arith.constant 0 : i32
    %c0_i32_0 = arith.constant 0 : i32
    %c0_i32_1 = arith.constant 0 : i32
    return %c0_i32, %c0_i32_0 : i32, i32
  }
  func.func @transform_6(%arg0: i32, %arg1: i32) -> (i32, i32) {
    %c0_i32 = arith.constant 0 : i32
    %c0_i32_0 = arith.constant 0 : i32
    %c0_i32_1 = arith.constant 0 : i32
    return %c0_i32, %c0_i32_0 : i32, i32
  }
  func.func @transform_7(%arg0: i32, %arg1: i32) -> (i32, i32) {
    %c0_i32 = arith.constant 0 : i32
    %c0_i32_0 = arith.constant 0 : i32
    %c0_i32_1 = arith.constant 0 : i32
    return %c0_i32, %c0_i32_0 : i32, i32
  }
  func.func @transform_8(%arg0: i32, %arg1: i32) -> (i32, i32) {
    %c0_i32 = arith.constant 0 : i32
    %c0_i32_0 = arith.constant 0 : i32
    %c0_i32_1 = arith.constant 0 : i32
    return %c0_i32, %c0_i32_0 : i32, i32
  }
  func.func @transform_9(%arg0: i32, %arg1: i32) -> (i32, i32) {
    %c0_i32 = arith.constant 0 : i32
    %c0_i32_0 = arith.constant 0 : i32
    %c0_i32_1 = arith.constant 0 : i32
    return %c0_i32, %c0_i32_0 : i32, i32
  }
  func.func @transform_10(%arg0: i32, %arg1: i32) -> (i32, i32) {
    %c0_i32 = arith.constant 0 : i32
    %c0_i32_0 = arith.constant 0 : i32
    return %arg0, %c0_i32 : i32, i32
  }
}

</mosaic_0001>

<bundles_post_ra>
// kernel: tpu_custom_call.1
= control target key start
LH: loop header
LB: loop body
LE: loop exit
PB: predicated region body
PF: predicated region fallthrough
CT: control target
= control target key end

     0   :  { %15 = vsyncpa [#allocation6], 0  ;;  %s3377_s0 = inlined_call_operand.hbm [shape: bf16[8,8,16], index: 0, kind: input, shape index: {}]   ;;  %s3378_s1 = inlined_call_operand.hbm [shape: bf16[16,512], index: 1, kind: input, shape index: {}]   ;;  %s3379_s2 = inlined_call_operand.hbm [shape: bf16[128,512], index: 2, kind: input, shape index: {}]   ;;  %s3380_s3 = inlined_call_operand.vmem [shape: f32[1,512], index: 3, kind: input, shape index: {}]   ;;  %s3381_s4 = inlined_call_operand.hbm [shape: bf16[128,128], index: 4, kind: input, shape index: {}]   ;;  %s3382_s5 = inlined_call_operand.vmem [shape: f32[1,128], index: 5, kind: input, shape index: {}]   ;;  %s3383_s6 = inlined_call_operand.hbm [shape: bf16[128,128], index: 6, kind: input, shape index: {}]   ;;  %s3384_s7 = inlined_call_operand.vmem [shape: f32[1,128], index: 7, kind: input, shape index: {}]   ;;  %s3385_s8 = inlined_call_operand.hbm [shape: bf16[128,128], index: 8, kind: input, shape index: {}]   ;;  %s3386_s9 = inlined_call_operand.vmem [shape: f32[1,128], index: 9, kind: input, shape index: {}]   ;;  %s3387_s10 = inlined_call_operand.hbm [shape: f32[8,128], index: 10, kind: output, shape index: {}]  }
   0x1   :  { %16 = vsyncpa [#allocation9], 0 }
   0x2   :  { %17 = vsyncpa [#allocation12], 0 }
   0x3   :  { %18 = vsyncpa [#allocation15], 0 }
   0x4   :  { %19 = vsyncpa [#allocation7], 0  ;;  %s2644_s13 = smov [#allocation8]  }
   0x5   :  { %s37_s14 = sshll.u32 %s2644_s13, 4  ;;  %s38_s14 = int_to_ptr.vmem [resolvable:$true] %s37_s14 }
   0x6   :  { %s2502_s15 = scalar_lea.vmem %s38_s14, 512  ;;  %p2507_p1 = scmp.lt.s32.totalorder %s38_s14, %s38_s14 }
   0x7   :  { %p2503_p0 = scmp.ne.s32.totalorder %s38_s14, %s2502_s15  ;;  %p2508_p2 = scmp.lt.s32.totalorder %s2502_s15, %s2502_s15 }
   0x9   :  { %p2509_p3 = por %p2508_p2, %p2507_p1 }
   0xb   :  { %p2510_p4 = pnand %p2509_p3, %p2503_p0 }
   0xd   :  { %2513 = shalt.err (!%p2510_p4)
}
   0xe   :  { %s2645_s16 = smov 256   ;;  %s2646_s17 = smov 16  }
   0xf   :  { %43 = dma.hbm_to_vmem [thread:$0]  %s3378_s1, 512, %s38_s14, [#allocation9], %s2645_s16, %s2645_s16, %s2646_s17  }
  0x10   :  { %s2647_s20 = smov [#allocation11]   ;;  %s2648_s22 = smov [#allocation5]  }
  0x11   :  { %s63_s21 = sshll.u32 %s2647_s20, 4  ;;  %s25_s23 = sshll.u32 %s2648_s22, 4  ;;  %s64_s21 = int_to_ptr.vmem [resolvable:$true] %s63_s21  ;;  %s26_s23 = int_to_ptr.vmem [resolvable:$true] %s25_s23 }
  0x12   :  { %s2522_s24 = scalar_lea.vmem %s64_s21, 1024  ;;  %p2527_p6 = scmp.lt.s32.totalorder %s64_s21, %s64_s21 }
  0x13   :  { %p2523_p5 = scmp.ne.s32.totalorder %s64_s21, %s2522_s24  ;;  %p2528_p7 = scmp.lt.s32.totalorder %s2522_s24, %s2522_s24 }
  0x15   :  { %p2529_p8 = por %p2528_p7, %p2527_p6 }
  0x17   :  { %p2530_p9 = pnand %p2529_p8, %p2523_p5 }
  0x19   :  { %2533 = shalt.err (!%p2530_p9)
}
  0x1a   :  { %s2649_s25 = smov 64   ;;  %s2650_s26 = smov 4  }
  0x1b   :  { %69 = dma.hbm_to_vmem [thread:$0]  %s3381_s4, 1024, %s64_s21, [#allocation12], %s2649_s25, %s2649_s25, %s2650_s26  }
  0x1c   :  { %s2542_s1 = scalar_lea.vmem %s26_s23, 512  ;;  %p2547_p11 = scmp.lt.s32.totalorder %s26_s23, %s26_s23 }
  0x1d   :  { %p2543_p10 = scmp.ne.s32.totalorder %s26_s23, %s2542_s1  ;;  %p2548_p12 = scmp.lt.s32.totalorder %s2542_s1, %s2542_s1 }
  0x1f   :  { %p2549_p13 = por %p2548_p12, %p2547_p11 }
  0x21   :  { %p2550_p0 = pnand %p2549_p13, %p2543_p10 }
  0x23   :  { %2553 = shalt.err (!%p2550_p0)
}
  0x24   :  { %31 = dma.hbm_to_vmem [thread:$0]  %s3377_s0, 512, %s26_s23, [#allocation6], %s2649_s25, %s2649_s25, %s2650_s26  }
  0x25   :  { %s2651_s11 = smov [#allocation10]   ;;  %s2652_s13 = smov [#allocation13]  }
  0x26   :  { %s49_s12 = sshll.u32 %s2651_s11, 4  ;;  %s77_s4 = sshll.u32 %s2652_s13, 4  ;;  %s50_s12 = int_to_ptr.vmem [resolvable:$true] %s49_s12  ;;  %s78_s4 = int_to_ptr.vmem [resolvable:$true] %s77_s4 }
  0x27   :  { %s2562_s14 = scalar_lea.vmem %s50_s12, 4096  ;;  %p2567_p2 = scmp.lt.s32.totalorder %s50_s12, %s50_s12 }
  0x28   :  { %p2563_p1 = scmp.ne.s32.totalorder %s50_s12, %s2562_s14  ;;  %p2568_p3 = scmp.lt.s32.totalorder %s2562_s14, %s2562_s14 }
  0x2a   :  { %p2569_p4 = por %p2568_p3, %p2567_p2 }
  0x2c   :  { %p2570_p5 = pnand %p2569_p4, %p2563_p1 }
  0x2e   :  { %2573 = shalt.err (!%p2570_p5)
}
  0x2f   :  { %55 = dma.hbm_to_vmem [thread:$0]  %s3379_s2, 4096, %s50_s12, [#allocation9], %s2645_s16, %s2645_s16, %s2646_s17  }
  0x30   :  { %s2582_s0 = scalar_lea.vmem %s78_s4, 1024  ;;  %p2587_p7 = scmp.lt.s32.totalorder %s78_s4, %s78_s4 }
  0x31   :  { %p2583_p6 = scmp.ne.s32.totalorder %s78_s4, %s2582_s0  ;;  %p2588_p8 = scmp.lt.s32.totalorder %s2582_s0, %s2582_s0 }
  0x33   :  { %p2589_p9 = por %p2588_p8, %p2587_p7 }
  0x35   :  { %p2590_p10 = pnand %p2589_p9, %p2583_p6 }
  0x37   :  { %2593 = shalt.err (!%p2590_p10)
}
  0x38   :  { %83 = dma.hbm_to_vmem [thread:$0]  %s3383_s6, 1024, %s78_s4, [#allocation12], %s2649_s25, %s2649_s25, %s2650_s26  }
  0x39   :  { %s2653_s21 = smov [#allocation14]  }
  0x3a   :  { %s91_s22 = sshll.u32 %s2653_s21, 4  ;;  %s92_s22 = int_to_ptr.vmem [resolvable:$true] %s91_s22 }
  0x3b   :  { %s2602_s23 = scalar_lea.vmem %s92_s22, 1024  ;;  %p2607_p12 = scmp.lt.s32.totalorder %s92_s22, %s92_s22 }
  0x3c   :  { %p2603_p11 = scmp.ne.s32.totalorder %s92_s22, %s2602_s23  ;;  %p2608_p13 = scmp.lt.s32.totalorder %s2602_s23, %s2602_s23 }
  0x3e   :  { %p2609_p0 = por %p2608_p13, %p2607_p12 }
  0x40   :  { %p2610_p1 = pnand %p2609_p0, %p2603_p11 }
  0x42   :  { %2613 = shalt.err (!%p2610_p1)
}
  0x43   :  { %97 = dma.hbm_to_vmem [thread:$0]  %s3385_s8, 1024, %s92_s22, [#allocation15], %s2649_s25, %s2649_s25, %s2650_s26  }
  0x44   :  { %2634 = dma.done.wait [#allocation6], 512  }
  0x45   :  { %2635 = vsyncadd [#allocation6], 4294966784 }
  0x46   :  { %2636 = dma.done.wait [#allocation9], 4608  }
  0x47   :  { %2637 = vsyncadd [#allocation9], 4294962688 }
  0x48   :  { %2638 = dma.done.wait [#allocation12], 2048  }
  0x49   :  { %2639 = vsyncadd [#allocation12], 4294965248 }
  0x4a   :  { %2640 = dma.done.wait [#allocation15], 1024  }
  0x4b   :  { %2641 = vsyncadd [#allocation15], 4294966272  ;;  %v3389_v0 = vmov 0   ;;  %v2248_v1 = vld [vmem:[#allocation8 + $0x4] ss:$16 sps:$4 sm:$0xff]   ;;  %vm177_vm0 = vcmask 130048   ;;  %v3388_v42 = vlaneseq }
  0x4c   :  { %222 = vmatprep.mubr.bf16.mxu0 %v3389_v0  ;;  %295 = vmatprep.mubr.bf16.mxu1 %v3389_v0  ;;  %v2250_v2 = vld [vmem:[#allocation8 + $0xc] ss:$16 sps:$4 sm:$0xff]   ;;  %v2252_v3 = vld [vmem:[#allocation8] ss:$16 sps:$4 sm:$0xff]   ;;  %v2253_v4 = vld [vmem:[#allocation8 + $0x8] ss:$16 sps:$4 sm:$0xff]  }
  0x4d   :  { %204 = vmatprep.subr.bf16.mxu0 %v2248_v1  ;;  %277 = vmatprep.subr.bf16.mxu1 %v2250_v2  ;;  %v2254_v5 = vld [vmem:[#allocation5] sm:$0xff]   ;;  %v2754_v7 = vld [vmem:[#allocation10 + $0xec] ss:$16 sps:$4 sm:$0xff]   ;;  %v2759_v9 = vld [vmem:[#allocation10 + $0xe8] ss:$16 sps:$4 sm:$0xff]   ;;  %v2655_v41 = vmov 0.0|0.0  }
  0x4e   :  { %205 = vmatpush1.bf16.msra.mxu0 %v2252_v3  ;;  %278 = vmatpush1.bf16.msra.mxu1 %v2253_v4  ;;  %v2752_v6 = vld [vmem:[#allocation10 + $0xe4] ss:$16 sps:$4 sm:$0xff]   ;;  %v2756_v8 = vld [vmem:[#allocation10 + $0xe0] ss:$16 sps:$4 sm:$0xff]   ;;  %v2767_v11 = vld [vmem:[#allocation10 + $0xcc] ss:$16 sps:$4 sm:$0xff]  }
  0x4f   :  { %675 = vmatprep.subr.bf16.mxu0 %v2752_v6  ;;  %v2763_v10 = vld [vmem:[#allocation10 + $0xc4] ss:$16 sps:$4 sm:$0xff]   ;;  %716 = vmatprep.subr.bf16.mxu1 %v2754_v7  ;;  %v2769_v12 = vld [vmem:[#allocation10 + $0xc0] ss:$16 sps:$4 sm:$0xff]   ;;  %v2771_v13 = vld [vmem:[#allocation10 + $0xc8] ss:$16 sps:$4 sm:$0xff]  }
  0x50   :  { %v2267_v14 = vld [vmem:[#allocation5 + $0x8] sm:$0xff]   ;;  %v2777_v15 = vld [vmem:[#allocation10 + $0xa4] ss:$16 sps:$4 sm:$0xff]   ;;  %v2783_v17 = vld [vmem:[#allocation10 + $0xa0] ss:$16 sps:$4 sm:$0xff]   ;;  %v491_v45 = vshrl.u32 %v3388_v42, 7 }
  0x51   :  { %2023 = vmatmul.mubr.msk.bf16.vlgmr.msra.gmra.mxu0 %vm177_vm0, %v2254_v5  ;;  %2027 = vmatmul.mubr.msk.bf16.vlgmr.msra.gmra.mxu1 %vm177_vm0, %v2254_v5  ;;  %v2780_v16 = vld [vmem:[#allocation10 + $0xac] ss:$16 sps:$4 sm:$0xff]   ;;  %v2785_v18 = vld [vmem:[#allocation10 + $0xa8] ss:$16 sps:$4 sm:$0xff]   ;;  %v2789_v19 = vld [vmem:[#allocation10 + $0x84] ss:$16 sps:$4 sm:$0xff]  }
  0x52   :  { %676 = vmatpush1.bf16.msra.mxu0 %v2756_v8  ;;  %717 = vmatpush1.bf16.msra.mxu1 %v2759_v9  ;;  %v2792_v20 = vld [vmem:[#allocation10 + $0x8c] ss:$16 sps:$4 sm:$0xff]   ;;  %v2796_v21 = vld [vmem:[#allocation10 + $0x80] ss:$16 sps:$4 sm:$0xff]   ;;  %v2799_v22 = vld [vmem:[#allocation10 + $0x88] ss:$16 sps:$4 sm:$0xff]  }
  0x53   :  { %677 = vmatprep.subr.bf16.mxu0 %v2763_v10  ;;  %718 = vmatprep.subr.bf16.mxu1 %v2767_v11  ;;  %v2804_v23 = vld [vmem:[#allocation10 + $0x64] ss:$16 sps:$4 sm:$0xff]   ;;  %v2808_v24 = vld [vmem:[#allocation10 + $0x6c] ss:$16 sps:$4 sm:$0xff]   ;;  %v2811_v26 = vld [vmem:[#allocation10 + $0x60] ss:$16 sps:$4 sm:$0xff]  }
  0x54   :  { %232 = vmatprep.mubr.bf16.mxu0 %v3389_v0  ;;  %305 = vmatprep.mubr.bf16.mxu1 %v3389_v0  ;;  %v2280_v25 = vld [vmem:[#allocation5 + $0x10] sm:$0xff]   ;;  %v2815_v27 = vld [vmem:[#allocation10 + $0x68] ss:$16 sps:$4 sm:$0xff]   ;;  %v2820_v29 = vld [vmem:[#allocation10 + $0x4c] ss:$16 sps:$4 sm:$0xff]   ;;  %v500_v48 = vsub.s32 2, %v491_v45 }
  0x55   :  { %v2817_v28 = vld [vmem:[#allocation10 + $0x44] ss:$16 sps:$4 sm:$0xff]   ;;  %v2825_v30 = vld [vmem:[#allocation10 + $0x40] ss:$16 sps:$4 sm:$0xff]   ;;  %v2827_v31 = vld [vmem:[#allocation10 + $0x48] ss:$16 sps:$4 sm:$0xff]  }
  0x56   :  { %678 = vmatpush1.bf16.msra.mxu0 %v2769_v12  ;;  %719 = vmatpush1.bf16.msra.mxu1 %v2771_v13  ;;  %v2293_v32 = vld [vmem:[#allocation5 + $0x18] sm:$0xff]   ;;  %v2832_v33 = vld [vmem:[#allocation10 + $0x24] ss:$16 sps:$4 sm:$0xff]   ;;  %v2838_v35 = vld [vmem:[#allocation10 + $0x20] ss:$16 sps:$4 sm:$0xff]   ;;  %v492_v51 = vsub.s32 0, %v491_v45 }
  0x57   :  { %679 = vmatprep.subr.bf16.mxu0 %v2777_v15  ;;  %720 = vmatprep.subr.bf16.mxu1 %v2780_v16  ;;  %v2836_v34 = vld [vmem:[#allocation10 + $0x2c] ss:$16 sps:$4 sm:$0xff]   ;;  %v2840_v36 = vld [vmem:[#allocation10 + $0x28] ss:$16 sps:$4 sm:$0xff]   ;;  %v2842_v37 = vld [vmem:[#allocation10 + $0x4] ss:$16 sps:$4 sm:$0xff]  }
  0x58   :  { %v2845_v38 = vld [vmem:[#allocation10 + $0xc] ss:$16 sps:$4 sm:$0xff]   ;;  %v2850_v39 = vld [vmem:[#allocation10] ss:$16 sps:$4 sm:$0xff]   ;;  %v2854_v40 = vld [vmem:[#allocation10 + $0x8] ss:$16 sps:$4 sm:$0xff]  }
  0x59   :  { %2024 = vmatmul.mubr.msk.bf16.gmra.mxu0 %vm177_vm0, %v2267_v14  ;;  %2028 = vmatmul.mubr.msk.bf16.gmra.mxu1 %vm177_vm0, %v2267_v14  ;;  %v504_v52 = vsub.s32 3, %v491_v45  ;;  %v480_v53 = vld [vmem:[%s3380_s3] sm:$0xf]  ;;  %v496_v56 = vsub.s32 1, %v491_v45  ;;  %vm2657_vm1 = vmmov 0  }
  0x5a   :  { %680 = vmatpush1.bf16.msra.mxu0 %v2783_v17  ;;  %242 = vmatprep.mubr.bf16.mxu0 %v3389_v0  ;;  %v2912_v59 = vrot.slane %v480_v53, %v500_v48  ;;  %v2914_v62 = vrot.slane %v480_v53, %v492_v51 }
  0x5b   :  { %721 = vmatpush1.bf16.msra.mxu1 %v2785_v18  ;;  %681 = vmatprep.subr.bf16.mxu0 %v2789_v19  ;;  %v2916_v63 = vrot.slane %v480_v53, %v504_v52 }
  0x5c   :  { %722 = vmatprep.subr.bf16.mxu1 %v2792_v20  ;;  %315 = vmatprep.mubr.bf16.mxu1 %v3389_v0 }
  0x5e   :  { %682 = vmatpush1.bf16.msra.mxu0 %v2796_v21 }
  0x5f   :  { %723 = vmatpush1.bf16.msra.mxu1 %v2799_v22  ;;  %683 = vmatprep.subr.bf16.mxu0 %v2804_v23 }
  0x60   :  { %724 = vmatprep.subr.bf16.mxu1 %v2808_v24 }
  0x61   :  { %2025 = vmatmul.mubr.msk.bf16.gmra.mxu0 %vm177_vm0, %v2280_v25  ;;  %2029 = vmatmul.mubr.msk.bf16.gmra.mxu1 %vm177_vm0, %v2280_v25  ;;  %v2918_v25 = vrot.slane %v480_v53, %v496_v56 }
  0x62   :  { %684 = vmatpush1.bf16.msra.mxu0 %v2811_v26  ;;  %252 = vmatprep.mubr.bf16.mxu0 %v3389_v0 }
  0x63   :  { %725 = vmatpush1.bf16.msra.mxu1 %v2815_v27  ;;  %685 = vmatprep.subr.bf16.mxu0 %v2817_v28 }
  0x64   :  { %726 = vmatprep.subr.bf16.mxu1 %v2820_v29  ;;  %325 = vmatprep.mubr.bf16.mxu1 %v3389_v0 }
  0x66   :  { %686 = vmatpush1.bf16.msra.mxu0 %v2825_v30 }
  0x67   :  { %727 = vmatpush1.bf16.msra.mxu1 %v2827_v31  ;;  %687 = vmatprep.subr.bf16.mxu0 %v2832_v33 }
  0x68   :  { %728 = vmatprep.subr.bf16.mxu1 %v2836_v34 }
  0x69   :  { %2026 = vmatmul.mubr.msk.bf16.gmra.mxu0 %vm177_vm0, %v2293_v32  ;;  %2030 = vmatmul.mubr.msk.bf16.gmra.mxu1 %vm177_vm0, %v2293_v32 }
  0x6a   :  { %688 = vmatpush1.bf16.msra.mxu0 %v2838_v35  ;;  %707 = vmatprep.mubr.bf16.mxu0 %v3389_v0 }
  0x6b   :  { %729 = vmatpush1.bf16.msra.mxu1 %v2840_v36  ;;  %689 = vmatprep.subr.bf16.mxu0 %v2842_v37 }
  0x6c   :  { %730 = vmatprep.subr.bf16.mxu1 %v2845_v38  ;;  %748 = vmatprep.mubr.bf16.mxu1 %v3389_v0 }
  0x6e   :  { %690 = vmatpush1.bf16.msra.mxu0 %v2850_v39 }
  0x6f   :  { %731 = vmatpush1.bf16.msra.mxu1 %v2854_v40  ;;  %797 = vmatprep.subr.bf16.mxu0 %v2752_v6 }
  0x70   :  { %838 = vmatprep.subr.bf16.mxu1 %v2754_v7 }
  0x71   :  { %708 = vmatmul.mubr.bf16.vlgmr.msra.gmra.mxu0 %v2655_v41 }
  0x72   :  { %749 = vmatmul.mubr.bf16.vlgmr.msra.gmra.mxu1 %v2655_v41  ;;  %798 = vmatpush1.bf16.msra.mxu0 %v2756_v8 }
  0x73   :  { %839 = vmatpush1.bf16.msra.mxu1 %v2759_v9  ;;  %799 = vmatprep.subr.bf16.mxu0 %v2763_v10 }
  0x74   :  { %840 = vmatprep.subr.bf16.mxu1 %v2767_v11  ;;  %829 = vmatprep.mubr.bf16.mxu0 %v3389_v0 }
  0x75   :  { %870 = vmatprep.mubr.bf16.mxu1 %v3389_v0 }
  0x76   :  { %800 = vmatpush1.bf16.msra.mxu0 %v2769_v12 }
  0x77   :  { %841 = vmatpush1.bf16.msra.mxu1 %v2771_v13  ;;  %801 = vmatprep.subr.bf16.mxu0 %v2777_v15 }
  0x78   :  { %842 = vmatprep.subr.bf16.mxu1 %v2780_v16 }
  0x7a   :  { %802 = vmatpush1.bf16.msra.mxu0 %v2783_v17 }
  0x7b   :  { %843 = vmatpush1.bf16.msra.mxu1 %v2785_v18  ;;  %803 = vmatprep.subr.bf16.mxu0 %v2789_v19 }
  0x7c   :  { %844 = vmatprep.subr.bf16.mxu1 %v2792_v20 }
  0x7e   :  { %804 = vmatpush1.bf16.msra.mxu0 %v2796_v21 }
  0x7f   :  { %845 = vmatpush1.bf16.msra.mxu1 %v2799_v22  ;;  %805 = vmatprep.subr.bf16.mxu0 %v2804_v23 }
  0x80   :  { %846 = vmatprep.subr.bf16.mxu1 %v2808_v24 }
  0x82   :  { %806 = vmatpush1.bf16.msra.mxu0 %v2811_v26 }
  0x83   :  { %847 = vmatpush1.bf16.msra.mxu1 %v2815_v27  ;;  %807 = vmatprep.subr.bf16.mxu0 %v2817_v28 }
  0x84   :  { %848 = vmatprep.subr.bf16.mxu1 %v2820_v29 }
  0x86   :  { %808 = vmatpush1.bf16.msra.mxu0 %v2825_v30 }
  0x87   :  { %849 = vmatpush1.bf16.msra.mxu1 %v2827_v31  ;;  %809 = vmatprep.subr.bf16.mxu0 %v2832_v33 }
  0x88   :  { %850 = vmatprep.subr.bf16.mxu1 %v2836_v34 }
  0x8a   :  { %810 = vmatpush1.bf16.msra.mxu0 %v2838_v35 }
  0x8b   :  { %851 = vmatpush1.bf16.msra.mxu1 %v2840_v36  ;;  %811 = vmatprep.subr.bf16.mxu0 %v2842_v37 }
  0x8c   :  { %852 = vmatprep.subr.bf16.mxu1 %v2845_v38 }
  0x8e   :  { %812 = vmatpush1.bf16.msra.mxu0 %v2850_v39 }
  0x8f   :  { %853 = vmatpush1.bf16.msra.mxu1 %v2854_v40  ;;  %919 = vmatprep.subr.bf16.mxu0 %v2752_v6 }
  0x90   :  { %960 = vmatprep.subr.bf16.mxu1 %v2754_v7 }
 0x111   :  { %v2900_v43 = vpop.f32.mrf.mxu0  ;;  %v2902_v44 = vpop.f32.mrf.mxu1 }
 0x113   :  { %v2905_v46 = vpop.f32.mrf.mxu0  ;;  %v2907_v47 = vpop.f32.mrf.mxu1 }
 0x115   :  { %v228_v49 = vpop.f32.mrf.mxu0  ;;  %v301_v50 = vpop.f32.mrf.mxu1 }
 0x117   :  { %v230_v54 = vpop.f32.mrf.mxu0  ;;  %v303_v55 = vpop.f32.mrf.mxu1 }
 0x118   :  { %v2132_v57 = vpack.c.bf16 %v230_v54, %v228_v49  ;;  %v2133_v58 = vpack.c.bf16 %v303_v55, %v301_v50 }
 0x119   :  { %v234_v60 = vpop.f32.mrf.mxu0  ;;  %v307_v61 = vpop.f32.mrf.mxu1 }
 0x11a   :  { %v788_v1 = vunpack.c.l.bf16 %v2132_v57  ;;  %v789_v2 = vunpack.c.h.bf16 %v2132_v57  ;;  %v790_v3 = vunpack.c.l.bf16 %v2133_v58  ;;  %v791_v4 = vunpack.c.h.bf16 %v2133_v58 }
 0x11b   :  { %v236_v5 = vpop.f32.mrf.mxu0  ;;  %v309_v14 = vpop.f32.mrf.mxu1 }
 0x11c   :  { %v2134_v32 = vpack.c.bf16 %v236_v5, %v234_v60  ;;  %v2135_v41 = vpack.c.bf16 %v309_v14, %v307_v61  ;;  %v2921_v45 = vadd.f32 %v788_v1, %v2914_v62  ;;  %v2924_v48 = vadd.f32 %v790_v3, %v2912_v59 }
 0x11d   :  { %v238_v49 = vpop.f32.mrf.mxu0  ;;  %v311_v50 = vpop.f32.mrf.mxu1  ;;  %v2927_v51 = vadd.f32 %v789_v2, %v2918_v25  ;;  %v2930_v52 = vadd.f32 %v791_v4, %v2916_v63 }
 0x11e   :  { %v910_v54 = vunpack.c.l.bf16 %v2134_v32  ;;  %v911_v55 = vunpack.c.h.bf16 %v2134_v32  ;;  %v912_v53 = vunpack.c.l.bf16 %v2135_v41  ;;  %v913_v56 = vunpack.c.h.bf16 %v2135_v41 }
 0x11f   :  { %v240_v57 = vpop.f32.mrf.mxu0  ;;  %v313_v58 = vpop.f32.mrf.mxu1 }
 0x120   :  { %v2136_v60 = vpack.c.bf16 %v240_v57, %v238_v49  ;;  %v2137_v61 = vpack.c.bf16 %v313_v58, %v311_v50  ;;  %v2933_v1 = vadd.f32 %v910_v54, %v2914_v62  ;;  %v2936_v3 = vadd.f32 %v912_v53, %v2912_v59 }
 0x121   :  { %v244_v5 = vpop.f32.mrf.mxu0  ;;  %v317_v2 = vpop.f32.mrf.mxu1  ;;  %v2939_v14 = vadd.f32 %v911_v55, %v2918_v25  ;;  %v2942_v4 = vadd.f32 %v913_v56, %v2916_v63 }
 0x122   :  { %3391 = vst [vmem:[#allocation22_spill] sm:$0xff] %v2933_v1  ;;  %3392 = vst [vmem:[#allocation23_spill] sm:$0xff] %v2936_v3  ;;  %v1032_v32 = vunpack.c.l.bf16 %v2136_v60  ;;  %v1033_v41 = vunpack.c.h.bf16 %v2136_v60  ;;  %v1034_v42 = vunpack.c.l.bf16 %v2137_v61  ;;  %v1035_v0 = vunpack.c.h.bf16 %v2137_v61 }
 0x123   :  { %3393 = vst [vmem:[#allocation24_spill] sm:$0xff] %v2939_v14  ;;  %3394 = vst [vmem:[#allocation25_spill] sm:$0xff] %v2942_v4  ;;  %v246_v49 = vpop.f32.mrf.mxu0  ;;  %v319_v50 = vpop.f32.mrf.mxu1 }
 0x124   :  { %v2138_v57 = vpack.c.bf16 %v246_v49, %v244_v5  ;;  %v2139_v54 = vpack.c.bf16 %v319_v50, %v317_v2  ;;  %v2945_v58 = vadd.f32 %v1032_v32, %v2914_v62  ;;  %v2948_v53 = vadd.f32 %v1034_v42, %v2912_v59 }
 0x125   :  { %v248_v3 = vpop.f32.mrf.mxu0  ;;  %v321_v55 = vpop.f32.mrf.mxu1  ;;  %v2951_v14 = vadd.f32 %v1033_v41, %v2918_v25  ;;  %v2954_v56 = vadd.f32 %v1035_v0, %v2916_v63  ;;  %v2130_v41 = vpack.c.bf16 %v2905_v46, %v2900_v43 }
 0x126   :  { %3395 = vst [vmem:[#allocation26_spill] sm:$0xff] %v2948_v53  ;;  %v1154_v60 = vunpack.c.l.bf16 %v2138_v57  ;;  %v1155_v61 = vunpack.c.h.bf16 %v2138_v57  ;;  %v1156_v4 = vunpack.c.l.bf16 %v2139_v54  ;;  %v1157_v1 = vunpack.c.h.bf16 %v2139_v54 }
 0x127   :  { %3396 = vst [vmem:[#allocation27_spill] sm:$0xff] %v2951_v14  ;;  %3397 = vst [vmem:[#allocation28_spill] sm:$0xff] %v2954_v56  ;;  %v250_v5 = vpop.f32.mrf.mxu0  ;;  %v323_v2 = vpop.f32.mrf.mxu1  ;;  %v485_v46 = vunpack.c.l.bf16 %v2130_v41 }
 0x128   :  { %v2140_v49 = vpack.c.bf16 %v250_v5, %v248_v3  ;;  %v2141_v32 = vpack.c.bf16 %v323_v2, %v321_v55  ;;  %v2957_v50 = vadd.f32 %v1154_v60, %v2914_v62  ;;  %v2960_v42 = vadd.f32 %v1156_v4, %v2912_v59 }
 0x129   :  { %v254_v53 = vpop.f32.mrf.mxu0  ;;  %v327_v0 = vpop.f32.mrf.mxu1  ;;  %v2965_v56 = vadd.f32 %v1155_v61, %v2918_v25  ;;  %v2968_v57 = vadd.f32 %v1157_v1, %v2916_v63  ;;  %v486_v61 = vunpack.c.h.bf16 %v2130_v41 }
 0x12a   :  { %3398 = vst [vmem:[#allocation29_spill] sm:$0xff] %v2957_v50  ;;  %3399 = vst [vmem:[#allocation30_spill] sm:$0xff] %v2960_v42  ;;  %v1276_v54 = vunpack.c.l.bf16 %v2140_v49  ;;  %v1277_v3 = vunpack.c.h.bf16 %v2140_v49  ;;  %v1278_v55 = vunpack.c.l.bf16 %v2141_v32  ;;  %v1279_v5 = vunpack.c.h.bf16 %v2141_v32 }
 0x12b   :  { %3400 = vst [vmem:[#allocation31_spill] sm:$0xff] %v2965_v56  ;;  %3401 = vst [vmem:[#allocation32_spill] sm:$0xff] %v2968_v57  ;;  %v256_v60 = vpop.f32.mrf.mxu0  ;;  %v329_v2 = vpop.f32.mrf.mxu1 }
 0x12c   :  { %v2142_v50 = vpack.c.bf16 %v256_v60, %v254_v53  ;;  %v2143_v4 = vpack.c.bf16 %v329_v2, %v327_v0  ;;  %v2971_v42 = vadd.f32 %v1276_v54, %v2914_v62  ;;  %v2974_v43 = vadd.f32 %v1278_v55, %v2912_v59 }
 0x12d   :  { %v258_v56 = vpop.f32.mrf.mxu0  ;;  %v331_v14 = vpop.f32.mrf.mxu1  ;;  %v2977_v1 = vadd.f32 %v1277_v3, %v2918_v25  ;;  %v2980_v49 = vadd.f32 %v1279_v5, %v2916_v63  ;;  %v510_v3 = vadd.f32 %v2914_v62, %v485_v46  ;;  %v511_v5 = vadd.f32 %v2918_v25, %v486_v61 }
 0x12e   :  { %3402 = vst [vmem:[#allocation33_spill] sm:$0xff] %v2971_v42  ;;  %3403 = vst [vmem:[#allocation34_spill] sm:$0xff] %v2974_v43  ;;  %v1398_v32 = vunpack.c.l.bf16 %v2142_v50  ;;  %v1399_v57 = vunpack.c.h.bf16 %v2142_v50  ;;  %v1400_v53 = vunpack.c.l.bf16 %v2143_v4  ;;  %v1401_v0 = vunpack.c.h.bf16 %v2143_v4 }
 0x12f   :  { %3404 = vst [vmem:[#allocation35_spill] sm:$0xff] %v2980_v49  ;;  %v260_v60 = vpop.f32.mrf.mxu0  ;;  %v333_v54 = vpop.f32.mrf.mxu1 }
 0x130   :  { %v2144_v2 = vpack.c.bf16 %v260_v60, %v258_v56  ;;  %v2145_v42 = vpack.c.bf16 %v333_v54, %v331_v14  ;;  %v2983_v55 = vadd.f32 %v1398_v32, %v2914_v62  ;;  %v2986_v41 = vadd.f32 %v1400_v53, %v2912_v59 }
 0x131   :  { %v709_v43 = vpop.f32.mrf.mxu0  ;;  %v2991_v49 = vadd.f32 %v1399_v57, %v2918_v25  ;;  %v2994_v50 = vadd.f32 %v1401_v0, %v2916_v63  ;;  %v2131_v53 = vpack.c.bf16 %v2907_v47, %v2902_v44 }
 0x132   :  { %3405 = vst [vmem:[#allocation36_spill] sm:$0xff] %v2983_v55  ;;  %3406 = vst [vmem:[#allocation37_spill] sm:$0xff] %v2986_v41  ;;  %v1520_v4 = vunpack.c.l.bf16 %v2144_v2  ;;  %v1521_v56 = vunpack.c.h.bf16 %v2144_v2  ;;  %v1522_v14 = vunpack.c.l.bf16 %v2145_v42  ;;  %v1523_v60 = vunpack.c.h.bf16 %v2145_v42  ;;  %v750_v32 = vpop.f32.mrf.mxu1 }
 0x133   :  { %3407 = vst [vmem:[#allocation38_spill] sm:$0xff] %v2991_v49  ;;  %3408 = vst [vmem:[#allocation39_spill] sm:$0xff] %v2994_v50  ;;  %v757_v54 = vadd.f32 %v709_v43, %v510_v3  ;;  %v711_v41 = vpop.f32.mrf.mxu0  ;;  %v488_v47 = vunpack.c.h.bf16 %v2131_v53  ;;  %v487_v3 = vunpack.c.l.bf16 %v2131_v53 }
 0x134   :  { %v758_v46 = vadd.f32 %v711_v41, %v511_v5  ;;  %v752_v55 = vpop.f32.mrf.mxu1  ;;  %v2999_v61 = vadd.f32 %v1520_v4, %v2914_v62  ;;  %v3002_v57 = vadd.f32 %v1522_v14, %v2912_v59  ;;  %v3005_v0 = vadd.f32 %v1521_v56, %v2918_v25 }
 0x135   :  { %v2079_v2 = vmul.f32 -1.442695, %v757_v54  ;;  %v713_v50 = vpop.f32.mrf.mxu0  ;;  %v3008_v42 = vadd.f32 %v1523_v60, %v2916_v63  ;;  %v513_v62 = vadd.f32 %v2916_v63, %v488_v47  ;;  %v512_v4 = vadd.f32 %v2912_v59, %v487_v3 }
 0x136   :  { %v2080_v49 = vmul.f32 -1.442695, %v758_v46  ;;  %v754_v44 = vpop.f32.mrf.mxu1 }
 0x137   :  { %2330 = vpow2.f32 %v2079_v2  ;;  %v714_v43 = vpop.f32.mrf.mxu0  ;;  %v760_v5 = vadd.f32 %v752_v55, %v513_v62  ;;  %v759_v56 = vadd.f32 %v750_v32, %v512_v4  ;;  %v3409_v62 = vmov 0  }
 0x138   :  { %2332 = vpow2.f32 %v2080_v49  ;;  %v755_v41 = vpop.f32.mrf.mxu1 }
 0x139   :  { %v2081_v25 = vmul.f32 -1.442695, %v760_v5 }
 0x13b   :  { %2334 = vpow2.f32 %v2081_v25 }
 0x13c   :  { %2336 = vtanh.f32 %v759_v56 }
 0x144   :  { %v2331_v14 = vpop.eup %2330 }
 0x145   :  { %v2333_v50 = vpop.eup %2332  ;;  %v764_v54 = vadd.f32 1.0, %v2331_v14 }
 0x146   :  { %v770_v60 = vadd.f32 1.0, %v2333_v50 }
 0x147   :  { %2338 = vrcp.f32 %v764_v54 }
 0x148   :  { %2340 = vrcp.f32 %v770_v60  ;;  %v2335_v46 = vpop.eup %2334 }
 0x149   :  { %v2337_v2 = vpop.eup %2336  ;;  %v777_v43 = vadd.f32 1.0, %v2335_v46 }
 0x14b   :  { %2342 = vrcp.f32 %v777_v43 }
 0x154   :  { %v2339_v49 = vpop.eup %2338 }
 0x155   :  { %v2341_v44 = vpop.eup %2340  ;;  %v781_v53 = vmul.f32 %v2339_v49, %v2337_v2 }
 0x156   :  { %v780_v63 = vmul.f32 0.0, %v2341_v44 }
 0x158   :  { %v3012_v55 = vadd.f32 %v781_v53, %v780_v63  ;;  %v2343_v59 = vpop.eup %2342 }
 0x15a   :  { %2344 = vtanh.f32 %v3012_v55 }
 0x167   :  { %v2345_v32 = vpop.eup %2344 }
 0x168   :  { %v784_v47 = vmul.f32 %v2345_v32, %v2343_v59 }
 0x16a   :  { %v796_v41 = vpack.c.bf16 %v784_v47, %v784_v47 }
 0x16c   :  { %830 = vmatmul.mubr.bf16.vlgmr.msra.gmra.mxu0 %v796_v41  ;;  %871 = vmatmul.mubr.bf16.vlgmr.msra.gmra.mxu1 %v796_v41 }
 0x16d   :  { %920 = vmatpush1.bf16.msra.mxu0 %v2756_v8  ;;  %961 = vmatpush1.bf16.msra.mxu1 %v2759_v9 }
 0x16e   :  { %921 = vmatprep.subr.bf16.mxu0 %v2763_v10  ;;  %962 = vmatprep.subr.bf16.mxu1 %v2767_v11 }
 0x16f   :  { %951 = vmatprep.mubr.bf16.mxu0 %v3409_v62  ;;  %992 = vmatprep.mubr.bf16.mxu1 %v3409_v62 }
 0x171   :  { %922 = vmatpush1.bf16.msra.mxu0 %v2769_v12  ;;  %963 = vmatpush1.bf16.msra.mxu1 %v2771_v13 }
 0x172   :  { %923 = vmatprep.subr.bf16.mxu0 %v2777_v15  ;;  %964 = vmatprep.subr.bf16.mxu1 %v2780_v16 }
 0x175   :  { %924 = vmatpush1.bf16.msra.mxu0 %v2783_v17  ;;  %965 = vmatpush1.bf16.msra.mxu1 %v2785_v18 }
 0x176   :  { %925 = vmatprep.subr.bf16.mxu0 %v2789_v19  ;;  %966 = vmatprep.subr.bf16.mxu1 %v2792_v20 }
 0x179   :  { %926 = vmatpush1.bf16.msra.mxu0 %v2796_v21  ;;  %967 = vmatpush1.bf16.msra.mxu1 %v2799_v22 }
 0x17a   :  { %927 = vmatprep.subr.bf16.mxu0 %v2804_v23  ;;  %968 = vmatprep.subr.bf16.mxu1 %v2808_v24 }
 0x17d   :  { %928 = vmatpush1.bf16.msra.mxu0 %v2811_v26  ;;  %969 = vmatpush1.bf16.msra.mxu1 %v2815_v27 }
 0x17e   :  { %929 = vmatprep.subr.bf16.mxu0 %v2817_v28  ;;  %970 = vmatprep.subr.bf16.mxu1 %v2820_v29 }
 0x181   :  { %930 = vmatpush1.bf16.msra.mxu0 %v2825_v30  ;;  %971 = vmatpush1.bf16.msra.mxu1 %v2827_v31 }
 0x182   :  { %931 = vmatprep.subr.bf16.mxu0 %v2832_v33  ;;  %972 = vmatprep.subr.bf16.mxu1 %v2836_v34 }
 0x185   :  { %932 = vmatpush1.bf16.msra.mxu0 %v2838_v35  ;;  %973 = vmatpush1.bf16.msra.mxu1 %v2840_v36 }
 0x186   :  { %933 = vmatprep.subr.bf16.mxu0 %v2842_v37  ;;  %974 = vmatprep.subr.bf16.mxu1 %v2845_v38 }
 0x189   :  { %934 = vmatpush1.bf16.msra.mxu0 %v2850_v39  ;;  %975 = vmatpush1.bf16.msra.mxu1 %v2854_v40 }
 0x18a   :  { %1041 = vmatprep.subr.bf16.mxu0 %v2752_v6  ;;  %1082 = vmatprep.subr.bf16.mxu1 %v2754_v7 }
 0x22c   :  { %v831_v3 = vpop.f32.mrf.mxu0  ;;  %v872_v5 = vpop.f32.mrf.mxu1 }
 0x22d   :  { %v879_v4 = vadd.f32 %v831_v3, %v2921_v45  ;;  %v881_v43 = vadd.f32 %v872_v5, %v2924_v48 }
 0x22e   :  { %v833_v25 = vpop.f32.mrf.mxu0  ;;  %v874_v56 = vpop.f32.mrf.mxu1 }
 0x22f   :  { %v2082_v14 = vmul.f32 -1.442695, %v879_v4  ;;  %v880_v50 = vadd.f32 %v833_v25, %v2927_v51  ;;  %v882_v44 = vadd.f32 %v874_v56, %v2930_v52 }
 0x230   :  { %v835_v54 = vpop.f32.mrf.mxu0  ;;  %v876_v60 = vpop.f32.mrf.mxu1 }
 0x231   :  { %2346 = vpow2.f32 %v2082_v14  ;;  %v2083_v46 = vmul.f32 -1.442695, %v880_v50  ;;  %v2084_v63 = vmul.f32 -1.442695, %v882_v44 }
 0x232   :  { %v836_v2 = vpop.f32.mrf.mxu0  ;;  %v877_v49 = vpop.f32.mrf.mxu1 }
 0x233   :  { %2348 = vpow2.f32 %v2083_v46  ;;  %v3411_v49 = vld [vmem:[#allocation24_spill] sm:$0xff] }
 0x234   :  { %2350 = vtanh.f32 %v881_v43 }
 0x235   :  { %2352 = vpow2.f32 %v2084_v63 }
 0x23e   :  { %v2347_v53 = vpop.eup %2346 }
 0x23f   :  { %v886_v59 = vadd.f32 1.0, %v2347_v53 }
 0x240   :  { %v2349_v45 = vpop.eup %2348 }
 0x241   :  { %2354 = vrcp.f32 %v886_v59  ;;  %v892_v32 = vadd.f32 1.0, %v2349_v45  ;;  %v2351_v51 = vpop.eup %2350 }
 0x242   :  { %v2353_v47 = vpop.eup %2352 }
 0x243   :  { %2356 = vrcp.f32 %v892_v32  ;;  %v899_v25 = vadd.f32 1.0, %v2353_v47  ;;  %v3412_v32 = vld [vmem:[#allocation25_spill] sm:$0xff] }
 0x245   :  { %2358 = vrcp.f32 %v899_v25 }
 0x24e   :  { %v2355_v41 = vpop.eup %2354 }
 0x24f   :  { %v903_v3 = vmul.f32 %v2355_v41, %v2351_v51  ;;  %v3413_v51 = vld [vmem:[#allocation23_spill] sm:$0xff] }
 0x250   :  { %v2357_v4 = vpop.eup %2356 }
 0x251   :  { %v902_v14 = vmul.f32 %v2357_v4, %v3012_v55  ;;  %v3410_v55 = vld [vmem:[#allocation22_spill] sm:$0xff] }
 0x252   :  { %v2359_v48 = vpop.eup %2358 }
 0x253   :  { %v3054_v52 = vadd.f32 %v903_v3, %v902_v14 }
 0x255   :  { %2360 = vtanh.f32 %v3054_v52 }
 0x262   :  { %v2361_v5 = vpop.eup %2360 }
 0x263   :  { %v906_v56 = vmul.f32 %v2361_v5, %v2359_v48 }
 0x265   :  { %v918_v50 = vpack.c.bf16 %v906_v56, %v906_v56 }
 0x267   :  { %952 = vmatmul.mubr.bf16.vlgmr.msra.gmra.mxu0 %v918_v50  ;;  %993 = vmatmul.mubr.bf16.vlgmr.msra.gmra.mxu1 %v918_v50 }
 0x268   :  { %1042 = vmatpush1.bf16.msra.mxu0 %v2756_v8  ;;  %1083 = vmatpush1.bf16.msra.mxu1 %v2759_v9 }
 0x269   :  { %1043 = vmatprep.subr.bf16.mxu0 %v2763_v10  ;;  %1084 = vmatprep.subr.bf16.mxu1 %v2767_v11 }
 0x26a   :  { %1073 = vmatprep.mubr.bf16.mxu0 %v3409_v62  ;;  %1114 = vmatprep.mubr.bf16.mxu1 %v3409_v62 }
 0x26c   :  { %1044 = vmatpush1.bf16.msra.mxu0 %v2769_v12  ;;  %1085 = vmatpush1.bf16.msra.mxu1 %v2771_v13 }
 0x26d   :  { %1045 = vmatprep.subr.bf16.mxu0 %v2777_v15  ;;  %1086 = vmatprep.subr.bf16.mxu1 %v2780_v16 }
 0x270   :  { %1046 = vmatpush1.bf16.msra.mxu0 %v2783_v17  ;;  %1087 = vmatpush1.bf16.msra.mxu1 %v2785_v18 }
 0x271   :  { %1047 = vmatprep.subr.bf16.mxu0 %v2789_v19  ;;  %1088 = vmatprep.subr.bf16.mxu1 %v2792_v20 }
 0x274   :  { %1048 = vmatpush1.bf16.msra.mxu0 %v2796_v21  ;;  %1089 = vmatpush1.bf16.msra.mxu1 %v2799_v22 }
 0x275   :  { %1049 = vmatprep.subr.bf16.mxu0 %v2804_v23  ;;  %1090 = vmatprep.subr.bf16.mxu1 %v2808_v24 }
 0x278   :  { %1050 = vmatpush1.bf16.msra.mxu0 %v2811_v26  ;;  %1091 = vmatpush1.bf16.msra.mxu1 %v2815_v27 }
 0x279   :  { %1051 = vmatprep.subr.bf16.mxu0 %v2817_v28  ;;  %1092 = vmatprep.subr.bf16.mxu1 %v2820_v29 }
 0x27c   :  { %1052 = vmatpush1.bf16.msra.mxu0 %v2825_v30  ;;  %1093 = vmatpush1.bf16.msra.mxu1 %v2827_v31 }
 0x27d   :  { %1053 = vmatprep.subr.bf16.mxu0 %v2832_v33  ;;  %1094 = vmatprep.subr.bf16.mxu1 %v2836_v34 }
 0x280   :  { %1054 = vmatpush1.bf16.msra.mxu0 %v2838_v35  ;;  %1095 = vmatpush1.bf16.msra.mxu1 %v2840_v36 }
 0x281   :  { %1055 = vmatprep.subr.bf16.mxu0 %v2842_v37  ;;  %1096 = vmatprep.subr.bf16.mxu1 %v2845_v38 }
 0x284   :  { %1056 = vmatpush1.bf16.msra.mxu0 %v2850_v39  ;;  %1097 = vmatpush1.bf16.msra.mxu1 %v2854_v40 }
 0x285   :  { %1163 = vmatprep.subr.bf16.mxu0 %v2752_v6  ;;  %1204 = vmatprep.subr.bf16.mxu1 %v2754_v7 }
 0x327   :  { %v953_v8 = vpop.f32.mrf.mxu0  ;;  %v994_v9 = vpop.f32.mrf.mxu1 }
 0x328   :  { %v1001_v54 = vadd.f32 %v953_v8, %v3410_v55  ;;  %v1003_v7 = vadd.f32 %v994_v9, %v3413_v51 }
 0x329   :  { %v955_v60 = vpop.f32.mrf.mxu0  ;;  %v996_v46 = vpop.f32.mrf.mxu1 }
 0x32a   :  { %v2085_v2 = vmul.f32 -1.442695, %v1001_v54  ;;  %v1002_v44 = vadd.f32 %v955_v60, %v3411_v49  ;;  %v1004_v6 = vadd.f32 %v996_v46, %v3412_v32  ;;  %v3099_v49 = vld [vmem:[#allocation10 + $0xe0] ss:$16 sps:$4 sm:$0xff]  }
 0x32b   :  { %v957_v43 = vpop.f32.mrf.mxu0  ;;  %v998_v63 = vpop.f32.mrf.mxu1 }
 0x32c   :  { %2362 = vpow2.f32 %v2085_v2  ;;  %v2086_v53 = vmul.f32 -1.442695, %v1002_v44  ;;  %v2087_v47 = vmul.f32 -1.442695, %v1004_v6  ;;  %v3102_v44 = vld [vmem:[#allocation10 + $0xe8] ss:$16 sps:$4 sm:$0xff]  }
 0x32d   :  { %v958_v59 = vpop.f32.mrf.mxu0  ;;  %v999_v45 = vpop.f32.mrf.mxu1 }
 0x32e   :  { %2364 = vpow2.f32 %v2086_v53 }
 0x32f   :  { %2366 = vtanh.f32 %v1003_v7  ;;  %v3151_v7 = vld [vmem:[#allocation10 + $0xc4] ss:$16 sps:$4 sm:$0xff]  }
 0x330   :  { %2368 = vpow2.f32 %v2087_v47  ;;  %v3154_v47 = vld [vmem:[#allocation10 + $0xcc] ss:$16 sps:$4 sm:$0xff]  }
 0x339   :  { %v2363_v41 = vpop.eup %2362 }
 0x33a   :  { %v1008_v3 = vadd.f32 1.0, %v2363_v41  ;;  %v3159_v41 = vld [vmem:[#allocation10 + $0xc0] ss:$16 sps:$4 sm:$0xff]  }
 0x33b   :  { %v2365_v4 = vpop.eup %2364 }
 0x33c   :  { %2370 = vrcp.f32 %v1008_v3  ;;  %v1014_v25 = vadd.f32 1.0, %v2365_v4  ;;  %v2367_v14 = vpop.eup %2366  ;;  %v3162_v3 = vld [vmem:[#allocation10 + $0xc8] ss:$16 sps:$4 sm:$0xff]   ;;  %v3165_v4 = vld [vmem:[#allocation10 + $0xa4] ss:$16 sps:$4 sm:$0xff]  }
 0x33d   :  { %v2369_v48 = vpop.eup %2368 }
 0x33e   :  { %2372 = vrcp.f32 %v1014_v25  ;;  %v1021_v8 = vadd.f32 1.0, %v2369_v48  ;;  %v3168_v25 = vld [vmem:[#allocation10 + $0xac] ss:$16 sps:$4 sm:$0xff]   ;;  %v3174_v48 = vld [vmem:[#allocation10 + $0xa8] ss:$16 sps:$4 sm:$0xff]  }
 0x340   :  { %2374 = vrcp.f32 %v1021_v8  ;;  %v3186_v8 = vld [vmem:[#allocation10 + $0x88] ss:$16 sps:$4 sm:$0xff]  }
 0x349   :  { %v2371_v5 = vpop.eup %2370 }
 0x34a   :  { %v1025_v56 = vmul.f32 %v2371_v5, %v2367_v14  ;;  %v3171_v14 = vld [vmem:[#allocation10 + $0xa0] ss:$16 sps:$4 sm:$0xff]   ;;  %v3177_v5 = vld [vmem:[#allocation10 + $0x84] ss:$16 sps:$4 sm:$0xff]  }
 0x34b   :  { %v2373_v50 = vpop.eup %2372 }
 0x34c   :  { %v1024_v55 = vmul.f32 %v2373_v50, %v3054_v52  ;;  %v3183_v50 = vld [vmem:[#allocation10 + $0x80] ss:$16 sps:$4 sm:$0xff]  }
 0x34d   :  { %v2375_v9 = vpop.eup %2374 }
 0x34e   :  { %v3096_v54 = vadd.f32 %v1025_v56, %v1024_v55  ;;  %v3180_v56 = vld [vmem:[#allocation10 + $0x8c] ss:$16 sps:$4 sm:$0xff]   ;;  %v3189_v55 = vld [vmem:[#allocation10 + $0x64] ss:$16 sps:$4 sm:$0xff]  }
 0x350   :  { %2376 = vtanh.f32 %v3096_v54 }
 0x35d   :  { %v2377_v60 = vpop.eup %2376 }
 0x35e   :  { %v1028_v46 = vmul.f32 %v2377_v60, %v2375_v9  ;;  %v3195_v9 = vld [vmem:[#allocation10 + $0x60] ss:$16 sps:$4 sm:$0xff]   ;;  %v3198_v60 = vld [vmem:[#allocation10 + $0x68] ss:$16 sps:$4 sm:$0xff]  }
 0x360   :  { %v1040_v2 = vpack.c.bf16 %v1028_v46, %v1028_v46  ;;  %v3201_v46 = vld [vmem:[#allocation10 + $0x44] ss:$16 sps:$4 sm:$0xff]  }
 0x362   :  { %1074 = vmatmul.mubr.bf16.vlgmr.msra.gmra.mxu0 %v1040_v2  ;;  %1115 = vmatmul.mubr.bf16.vlgmr.msra.gmra.mxu1 %v1040_v2  ;;  %v3204_v2 = vld [vmem:[#allocation10 + $0x4c] ss:$16 sps:$4 sm:$0xff]  }
 0x363   :  { %1164 = vmatpush1.bf16.msra.mxu0 %v3099_v49  ;;  %1205 = vmatpush1.bf16.msra.mxu1 %v3102_v44 }
 0x364   :  { %1165 = vmatprep.subr.bf16.mxu0 %v2763_v10  ;;  %1206 = vmatprep.subr.bf16.mxu1 %v2767_v11  ;;  %v3135_v10 = vld [vmem:[#allocation10 + $0xe4] ss:$16 sps:$4 sm:$0xff]   ;;  %v3138_v11 = vld [vmem:[#allocation10 + $0xec] ss:$16 sps:$4 sm:$0xff]  }
 0x365   :  { %1195 = vmatprep.mubr.bf16.mxu0 %v3409_v62  ;;  %1236 = vmatprep.mubr.bf16.mxu1 %v3409_v62 }
 0x367   :  { %1166 = vmatpush1.bf16.msra.mxu0 %v2769_v12  ;;  %1207 = vmatpush1.bf16.msra.mxu1 %v2771_v13 }
 0x368   :  { %1167 = vmatprep.subr.bf16.mxu0 %v2777_v15  ;;  %1208 = vmatprep.subr.bf16.mxu1 %v2780_v16 }
 0x36b   :  { %1168 = vmatpush1.bf16.msra.mxu0 %v2783_v17  ;;  %1209 = vmatpush1.bf16.msra.mxu1 %v2785_v18 }
 0x36c   :  { %1169 = vmatprep.subr.bf16.mxu0 %v2789_v19  ;;  %1210 = vmatprep.subr.bf16.mxu1 %v2792_v20  ;;  %v3414_v19 = vld [vmem:[#allocation27_spill] sm:$0xff] }
 0x36f   :  { %1170 = vmatpush1.bf16.msra.mxu0 %v2796_v21  ;;  %1211 = vmatpush1.bf16.msra.mxu1 %v2799_v22 }
 0x370   :  { %1171 = vmatprep.subr.bf16.mxu0 %v2804_v23  ;;  %1212 = vmatprep.subr.bf16.mxu1 %v2808_v24 }
 0x373   :  { %1172 = vmatpush1.bf16.msra.mxu0 %v2811_v26  ;;  %1213 = vmatpush1.bf16.msra.mxu1 %v2815_v27  ;;  %v3415_v27 = vld [vmem:[#allocation28_spill] sm:$0xff] }
 0x374   :  { %1173 = vmatprep.subr.bf16.mxu0 %v2817_v28  ;;  %1214 = vmatprep.subr.bf16.mxu1 %v2820_v29  ;;  %v3416_v29 = vld [vmem:[#allocation26_spill] sm:$0xff] }
 0x377   :  { %1174 = vmatpush1.bf16.msra.mxu0 %v2825_v30  ;;  %1215 = vmatpush1.bf16.msra.mxu1 %v2827_v31 }
 0x378   :  { %1175 = vmatprep.subr.bf16.mxu0 %v2832_v33  ;;  %1216 = vmatprep.subr.bf16.mxu1 %v2836_v34 }
 0x37b   :  { %1176 = vmatpush1.bf16.msra.mxu0 %v2838_v35  ;;  %1217 = vmatpush1.bf16.msra.mxu1 %v2840_v36 }
 0x37c   :  { %1177 = vmatprep.subr.bf16.mxu0 %v2842_v37  ;;  %1218 = vmatprep.subr.bf16.mxu1 %v2845_v38 }
 0x37f   :  { %1178 = vmatpush1.bf16.msra.mxu0 %v2850_v39  ;;  %1219 = vmatpush1.bf16.msra.mxu1 %v2854_v40 }
 0x380   :  { %1285 = vmatprep.subr.bf16.mxu0 %v3135_v10  ;;  %1326 = vmatprep.subr.bf16.mxu1 %v3138_v11 }
 0x422   :  { %v1075_v12 = vpop.f32.mrf.mxu0  ;;  %v1116_v13 = vpop.f32.mrf.mxu1 }
 0x423   :  { %v1123_v15 = vadd.f32 %v1075_v12, %v2945_v58  ;;  %v1125_v30 = vadd.f32 %v1116_v13, %v3416_v29  ;;  %v3207_v12 = vld [vmem:[#allocation10 + $0x40] ss:$16 sps:$4 sm:$0xff]   ;;  %v3210_v13 = vld [vmem:[#allocation10 + $0x48] ss:$16 sps:$4 sm:$0xff]  }
 0x424   :  { %v1077_v16 = vpop.f32.mrf.mxu0  ;;  %v1118_v17 = vpop.f32.mrf.mxu1  ;;  %v3418_v29 = vld [vmem:[#allocation31_spill] sm:$0xff] }
 0x425   :  { %v2088_v18 = vmul.f32 -1.442695, %v1123_v15  ;;  %v1124_v20 = vadd.f32 %v1077_v16, %v3414_v19  ;;  %v1126_v28 = vadd.f32 %v1118_v17, %v3415_v27  ;;  %v3213_v15 = vld [vmem:[#allocation10 + $0x24] ss:$16 sps:$4 sm:$0xff]   ;;  %v3216_v16 = vld [vmem:[#allocation10 + $0x2c] ss:$16 sps:$4 sm:$0xff]  }
 0x426   :  { %v1079_v21 = vpop.f32.mrf.mxu0  ;;  %v1120_v22 = vpop.f32.mrf.mxu1  ;;  %v3219_v17 = vld [vmem:[#allocation10 + $0x20] ss:$16 sps:$4 sm:$0xff]   ;;  %v3225_v19 = vld [vmem:[#allocation10 + $0x4] ss:$16 sps:$4 sm:$0xff]  }
 0x427   :  { %2378 = vpow2.f32 %v2088_v18  ;;  %v2089_v23 = vmul.f32 -1.442695, %v1124_v20  ;;  %v2090_v31 = vmul.f32 -1.442695, %v1126_v28  ;;  %v3222_v18 = vld [vmem:[#allocation10 + $0x28] ss:$16 sps:$4 sm:$0xff]  }
 0x428   :  { %v1080_v24 = vpop.f32.mrf.mxu0  ;;  %v1121_v26 = vpop.f32.mrf.mxu1  ;;  %v3228_v20 = vld [vmem:[#allocation10 + $0xc] ss:$16 sps:$4 sm:$0xff]  }
 0x429   :  { %2380 = vpow2.f32 %v2089_v23  ;;  %v3417_v23 = vld [vmem:[#allocation29_spill] sm:$0xff] }
 0x42a   :  { %2382 = vtanh.f32 %v1125_v30 }
 0x42b   :  { %2384 = vpow2.f32 %v2090_v31 }
 0x434   :  { %v2379_v33 = vpop.eup %2378 }
 0x435   :  { %v1130_v34 = vadd.f32 1.0, %v2379_v33 }
 0x436   :  { %v2381_v35 = vpop.eup %2380 }
 0x437   :  { %2386 = vrcp.f32 %v1130_v34  ;;  %v1136_v36 = vadd.f32 1.0, %v2381_v35  ;;  %v2383_v37 = vpop.eup %2382 }
 0x438   :  { %v2385_v38 = vpop.eup %2384 }
 0x439   :  { %2388 = vrcp.f32 %v1136_v36  ;;  %v1143_v63 = vadd.f32 1.0, %v2385_v38 }
 0x43b   :  { %2390 = vrcp.f32 %v1143_v63 }
 0x444   :  { %v2387_v58 = vpop.eup %2386 }
 0x445   :  { %v1147_v52 = vmul.f32 %v2387_v58, %v2383_v37  ;;  %v3420_v37 = vld [vmem:[#allocation30_spill] sm:$0xff] }
 0x446   :  { %v2389_v43 = vpop.eup %2388 }
 0x447   :  { %v1146_v53 = vmul.f32 %v2389_v43, %v3096_v54  ;;  %v3192_v54 = vld [vmem:[#allocation10 + $0x6c] ss:$16 sps:$4 sm:$0xff]  }
 0x448   :  { %v2391_v45 = vpop.eup %2390 }
 0x449   :  { %v3146_v59 = vadd.f32 %v1147_v52, %v1146_v53 }
 0x44b   :  { %2392 = vtanh.f32 %v3146_v59 }
 0x458   :  { %v2393_v32 = vpop.eup %2392 }
 0x459   :  { %v1150_v6 = vmul.f32 %v2393_v32, %v2391_v45 }
 0x45b   :  { %v1162_v51 = vpack.c.bf16 %v1150_v6, %v1150_v6 }
 0x45d   :  { %1196 = vmatmul.mubr.bf16.vlgmr.msra.gmra.mxu0 %v1162_v51  ;;  %1237 = vmatmul.mubr.bf16.vlgmr.msra.gmra.mxu1 %v1162_v51 }
 0x45e   :  { %1286 = vmatpush1.bf16.msra.mxu0 %v3099_v49  ;;  %1327 = vmatpush1.bf16.msra.mxu1 %v3102_v44 }
 0x45f   :  { %1287 = vmatprep.subr.bf16.mxu0 %v3151_v7  ;;  %1328 = vmatprep.subr.bf16.mxu1 %v3154_v47 }
 0x460   :  { %1317 = vmatprep.mubr.bf16.mxu0 %v3409_v62  ;;  %1358 = vmatprep.mubr.bf16.mxu1 %v3409_v62 }
 0x462   :  { %1288 = vmatpush1.bf16.msra.mxu0 %v3159_v41  ;;  %1329 = vmatpush1.bf16.msra.mxu1 %v3162_v3 }
 0x463   :  { %1289 = vmatprep.subr.bf16.mxu0 %v3165_v4  ;;  %1330 = vmatprep.subr.bf16.mxu1 %v3168_v25 }
 0x466   :  { %1290 = vmatpush1.bf16.msra.mxu0 %v3171_v14  ;;  %1331 = vmatpush1.bf16.msra.mxu1 %v3174_v48 }
 0x467   :  { %1291 = vmatprep.subr.bf16.mxu0 %v3177_v5  ;;  %1332 = vmatprep.subr.bf16.mxu1 %v3180_v56 }
 0x46a   :  { %1292 = vmatpush1.bf16.msra.mxu0 %v3183_v50  ;;  %1333 = vmatpush1.bf16.msra.mxu1 %v3186_v8 }
 0x46b   :  { %1293 = vmatprep.subr.bf16.mxu0 %v3189_v55  ;;  %1334 = vmatprep.subr.bf16.mxu1 %v3192_v54 }
 0x46e   :  { %1294 = vmatpush1.bf16.msra.mxu0 %v3195_v9  ;;  %1335 = vmatpush1.bf16.msra.mxu1 %v3198_v60 }
 0x46f   :  { %1295 = vmatprep.subr.bf16.mxu0 %v3201_v46  ;;  %1336 = vmatprep.subr.bf16.mxu1 %v3204_v2 }
 0x472   :  { %1296 = vmatpush1.bf16.msra.mxu0 %v3207_v12  ;;  %1337 = vmatpush1.bf16.msra.mxu1 %v3210_v13 }
 0x473   :  { %1297 = vmatprep.subr.bf16.mxu0 %v3213_v15  ;;  %1338 = vmatprep.subr.bf16.mxu1 %v3216_v16 }
 0x476   :  { %1298 = vmatpush1.bf16.msra.mxu0 %v3219_v17  ;;  %1339 = vmatpush1.bf16.msra.mxu1 %v3222_v18 }
 0x477   :  { %1299 = vmatprep.subr.bf16.mxu0 %v3225_v19  ;;  %1340 = vmatprep.subr.bf16.mxu1 %v3228_v20 }
 0x47a   :  { %1300 = vmatpush1.bf16.msra.mxu0 %v2850_v39  ;;  %1341 = vmatpush1.bf16.msra.mxu1 %v2854_v40  ;;  %v3419_v40 = vld [vmem:[#allocation32_spill] sm:$0xff] }
 0x47b   :  { %1407 = vmatprep.subr.bf16.mxu0 %v3135_v10  ;;  %1448 = vmatprep.subr.bf16.mxu1 %v3138_v11 }
 0x51d   :  { %v1197_v21 = vpop.f32.mrf.mxu0  ;;  %v1238_v22 = vpop.f32.mrf.mxu1 }
 0x51e   :  { %v1245_v24 = vadd.f32 %v1197_v21, %v3417_v23  ;;  %v1247_v38 = vadd.f32 %v1238_v22, %v3420_v37 }
 0x51f   :  { %v1199_v26 = vpop.f32.mrf.mxu0  ;;  %v1240_v27 = vpop.f32.mrf.mxu1 }
 0x520   :  { %v2091_v28 = vmul.f32 -1.442695, %v1245_v24  ;;  %v1246_v30 = vadd.f32 %v1199_v26, %v3418_v29  ;;  %v1248_v36 = vadd.f32 %v1240_v27, %v3419_v40 }
 0x521   :  { %v1201_v31 = vpop.f32.mrf.mxu0  ;;  %v1242_v33 = vpop.f32.mrf.mxu1 }
 0x522   :  { %2394 = vpow2.f32 %v2091_v28  ;;  %v2092_v34 = vmul.f32 -1.442695, %v1246_v30  ;;  %v2093_v58 = vmul.f32 -1.442695, %v1248_v36  ;;  %v3276_v30 = vld [vmem:[#allocation10 + $0x8] ss:$16 sps:$4 sm:$0xff]  }
 0x523   :  { %v1202_v39 = vpop.f32.mrf.mxu0  ;;  %v1243_v35 = vpop.f32.mrf.mxu1 }
 0x524   :  { %2396 = vpow2.f32 %v2092_v34  ;;  %v3421_v34 = vld [vmem:[#allocation33_spill] sm:$0xff] }
 0x525   :  { %2398 = vtanh.f32 %v1247_v38 }
 0x526   :  { %2400 = vpow2.f32 %v2093_v58 }
 0x52f   :  { %v2395_v52 = vpop.eup %2394 }
 0x530   :  { %v1252_v43 = vadd.f32 1.0, %v2395_v52 }
 0x531   :  { %v2397_v63 = vpop.eup %2396 }
 0x532   :  { %2402 = vrcp.f32 %v1252_v43  ;;  %v1258_v53 = vadd.f32 1.0, %v2397_v63  ;;  %v2399_v45 = vpop.eup %2398 }
 0x533   :  { %v2401_v32 = vpop.eup %2400 }
 0x534   :  { %2404 = vrcp.f32 %v1258_v53  ;;  %v1265_v23 = vadd.f32 1.0, %v2401_v32  ;;  %v3422_v53 = vld [vmem:[#allocation35_spill] sm:$0xff] }
 0x536   :  { %2406 = vrcp.f32 %v1265_v23 }
 0x53f   :  { %v2403_v6 = vpop.eup %2402 }
 0x540   :  { %v1269_v51 = vmul.f32 %v2403_v6, %v2399_v45  ;;  %v3423_v45 = vld [vmem:[#allocation34_spill] sm:$0xff] }
 0x541   :  { %v2405_v21 = vpop.eup %2404 }
 0x542   :  { %v1268_v24 = vmul.f32 %v2405_v21, %v3146_v59  ;;  %v3273_v59 = vld [vmem:[#allocation10] ss:$16 sps:$4 sm:$0xff]  }
 0x543   :  { %v2407_v22 = vpop.eup %2406 }
 0x544   :  { %v3240_v26 = vadd.f32 %v1269_v51, %v1268_v24 }
 0x546   :  { %2408 = vtanh.f32 %v3240_v26 }
 0x553   :  { %v2409_v27 = vpop.eup %2408 }
 0x554   :  { %v1272_v28 = vmul.f32 %v2409_v27, %v2407_v22 }
 0x556   :  { %v1284_v29 = vpack.c.bf16 %v1272_v28, %v1272_v28 }
 0x558   :  { %1318 = vmatmul.mubr.bf16.vlgmr.msra.gmra.mxu0 %v1284_v29  ;;  %1359 = vmatmul.mubr.bf16.vlgmr.msra.gmra.mxu1 %v1284_v29 }
 0x559   :  { %1408 = vmatpush1.bf16.msra.mxu0 %v3099_v49  ;;  %1449 = vmatpush1.bf16.msra.mxu1 %v3102_v44 }
 0x55a   :  { %1409 = vmatprep.subr.bf16.mxu0 %v3151_v7  ;;  %1450 = vmatprep.subr.bf16.mxu1 %v3154_v47 }
 0x55b   :  { %1439 = vmatprep.mubr.bf16.mxu0 %v3409_v62  ;;  %1480 = vmatprep.mubr.bf16.mxu1 %v3409_v62 }
 0x55d   :  { %1410 = vmatpush1.bf16.msra.mxu0 %v3159_v41  ;;  %1451 = vmatpush1.bf16.msra.mxu1 %v3162_v3 }
 0x55e   :  { %1411 = vmatprep.subr.bf16.mxu0 %v3165_v4  ;;  %1452 = vmatprep.subr.bf16.mxu1 %v3168_v25 }
 0x561   :  { %1412 = vmatpush1.bf16.msra.mxu0 %v3171_v14  ;;  %1453 = vmatpush1.bf16.msra.mxu1 %v3174_v48 }
 0x562   :  { %1413 = vmatprep.subr.bf16.mxu0 %v3177_v5  ;;  %1454 = vmatprep.subr.bf16.mxu1 %v3180_v56 }
 0x565   :  { %1414 = vmatpush1.bf16.msra.mxu0 %v3183_v50  ;;  %1455 = vmatpush1.bf16.msra.mxu1 %v3186_v8 }
 0x566   :  { %1415 = vmatprep.subr.bf16.mxu0 %v3189_v55  ;;  %1456 = vmatprep.subr.bf16.mxu1 %v3192_v54 }
 0x569   :  { %1416 = vmatpush1.bf16.msra.mxu0 %v3195_v9  ;;  %1457 = vmatpush1.bf16.msra.mxu1 %v3198_v60 }
 0x56a   :  { %1417 = vmatprep.subr.bf16.mxu0 %v3201_v46  ;;  %1458 = vmatprep.subr.bf16.mxu1 %v3204_v2 }
 0x56d   :  { %1418 = vmatpush1.bf16.msra.mxu0 %v3207_v12  ;;  %1459 = vmatpush1.bf16.msra.mxu1 %v3210_v13 }
 0x56e   :  { %1419 = vmatprep.subr.bf16.mxu0 %v3213_v15  ;;  %1460 = vmatprep.subr.bf16.mxu1 %v3216_v16 }
 0x571   :  { %1420 = vmatpush1.bf16.msra.mxu0 %v3219_v17  ;;  %1461 = vmatpush1.bf16.msra.mxu1 %v3222_v18 }
 0x572   :  { %1421 = vmatprep.subr.bf16.mxu0 %v3225_v19  ;;  %1462 = vmatprep.subr.bf16.mxu1 %v3228_v20 }
 0x575   :  { %1422 = vmatpush1.bf16.msra.mxu0 %v3273_v59  ;;  %1463 = vmatpush1.bf16.msra.mxu1 %v3276_v30 }
 0x576   :  { %1529 = vmatprep.subr.bf16.mxu0 %v3135_v10  ;;  %1570 = vmatprep.subr.bf16.mxu1 %v3138_v11 }
 0x618   :  { %v1319_v31 = vpop.f32.mrf.mxu0  ;;  %v1360_v33 = vpop.f32.mrf.mxu1 }
 0x619   :  { %v1367_v39 = vadd.f32 %v1319_v31, %v3421_v34  ;;  %v1369_v11 = vadd.f32 %v1360_v33, %v3423_v45  ;;  %v2311_v45 = vld [vmem:[#allocation11 + $0x10] sm:$0xff]  }
 0x61a   :  { %v1321_v35 = vpop.f32.mrf.mxu0  ;;  %v1362_v40 = vpop.f32.mrf.mxu1 }
 0x61b   :  { %v2094_v36 = vmul.f32 -1.442695, %v1367_v39  ;;  %v1368_v37 = vadd.f32 %v1321_v35, %v2977_v1  ;;  %v1370_v10 = vadd.f32 %v1362_v40, %v3422_v53  ;;  %v2309_v53 = vld [vmem:[#allocation11 + $0x20] sm:$0xff]  }
 0x61c   :  { %v1323_v38 = vpop.f32.mrf.mxu0  ;;  %v1364_v58 = vpop.f32.mrf.mxu1 }
 0x61d   :  { %2410 = vpow2.f32 %v2094_v36  ;;  %v2095_v52 = vmul.f32 -1.442695, %v1368_v37  ;;  %v2096_v32 = vmul.f32 -1.442695, %v1370_v10  ;;  %v2306_v58 = vld [vmem:[#allocation11 + $0x38] sm:$0xff]  }
 0x61e   :  { %v1324_v43 = vpop.f32.mrf.mxu0  ;;  %v1365_v63 = vpop.f32.mrf.mxu1  ;;  %v2310_v10 = vld [vmem:[#allocation11 + $0x18] sm:$0xff]  }
 0x61f   :  { %2412 = vpow2.f32 %v2095_v52  ;;  %v2656_v52 = vmov 0.0   ;;  %v2307_v43 = vld [vmem:[#allocation11 + $0x30] sm:$0xff]   ;;  %v2308_v63 = vld [vmem:[#allocation11 + $0x28] sm:$0xff]  }
 0x620   :  { %2414 = vtanh.f32 %v1369_v11  ;;  %v2312_v11 = vld [vmem:[#allocation11 + $0x8] sm:$0xff]  }
 0x621   :  { %2416 = vpow2.f32 %v2096_v32  ;;  %v2313_v32 = vld [vmem:[#allocation11] sm:$0xff]  }
 0x62a   :  { %v2411_v6 = vpop.eup %2410 }
 0x62b   :  { %v1374_v51 = vadd.f32 1.0, %v2411_v6  ;;  %v2314_v6 = vld [vmem:[#allocation13 + $0x38] sm:$0xff]  }
 0x62c   :  { %v2413_v21 = vpop.eup %2412 }
 0x62d   :  { %2418 = vrcp.f32 %v1374_v51  ;;  %v1380_v23 = vadd.f32 1.0, %v2413_v21  ;;  %v2415_v1 = vpop.eup %2414  ;;  %v2315_v51 = vld [vmem:[#allocation13 + $0x30] sm:$0xff]   ;;  %v2316_v21 = vld [vmem:[#allocation13 + $0x28] sm:$0xff]  }
 0x62e   :  { %v2417_v24 = vpop.eup %2416 }
 0x62f   :  { %2420 = vrcp.f32 %v1380_v23  ;;  %v1387_v29 = vadd.f32 1.0, %v2417_v24  ;;  %v2317_v23 = vld [vmem:[#allocation13 + $0x20] sm:$0xff]   ;;  %v2319_v24 = vld [vmem:[#allocation13 + $0x10] sm:$0xff]  }
 0x631   :  { %2422 = vrcp.f32 %v1387_v29 }
 0x63a   :  { %v2419_v22 = vpop.eup %2418 }
 0x63b   :  { %v1391_v27 = vmul.f32 %v2419_v22, %v2415_v1  ;;  %v2318_v1 = vld [vmem:[#allocation13 + $0x18] sm:$0xff]  }
 0x63c   :  { %v2421_v28 = vpop.eup %2420 }
 0x63d   :  { %v1390_v31 = vmul.f32 %v2421_v28, %v3240_v26 }
 0x63e   :  { %v2423_v33 = vpop.eup %2422 }
 0x63f   :  { %v3286_v34 = vadd.f32 %v1391_v27, %v1390_v31 }
 0x641   :  { %2424 = vtanh.f32 %v3286_v34 }
 0x64e   :  { %v2425_v39 = vpop.eup %2424 }
 0x64f   :  { %v1394_v35 = vmul.f32 %v2425_v39, %v2423_v33 }
 0x651   :  { %v1406_v40 = vpack.c.bf16 %v1394_v35, %v1394_v35 }
 0x653   :  { %1440 = vmatmul.mubr.bf16.vlgmr.msra.gmra.mxu0 %v1406_v40  ;;  %1481 = vmatmul.mubr.bf16.vlgmr.msra.gmra.mxu1 %v1406_v40 }
 0x654   :  { %1530 = vmatpush1.bf16.msra.mxu0 %v3099_v49  ;;  %1571 = vmatpush1.bf16.msra.mxu1 %v3102_v44  ;;  %v3424_v44 = vld [vmem:[#allocation36_spill] sm:$0xff] }
 0x655   :  { %1531 = vmatprep.subr.bf16.mxu0 %v3151_v7  ;;  %1572 = vmatprep.subr.bf16.mxu1 %v3154_v47 }
 0x656   :  { %1561 = vmatprep.mubr.bf16.mxu0 %v3409_v62  ;;  %1602 = vmatprep.mubr.bf16.mxu1 %v3409_v62 }
 0x658   :  { %1532 = vmatpush1.bf16.msra.mxu0 %v3159_v41  ;;  %1573 = vmatpush1.bf16.msra.mxu1 %v3162_v3 }
 0x659   :  { %1533 = vmatprep.subr.bf16.mxu0 %v3165_v4  ;;  %1574 = vmatprep.subr.bf16.mxu1 %v3168_v25  ;;  %v3425_v4 = vld [vmem:[#allocation38_spill] sm:$0xff] }
 0x65c   :  { %1534 = vmatpush1.bf16.msra.mxu0 %v3171_v14  ;;  %1575 = vmatpush1.bf16.msra.mxu1 %v3174_v48 }
 0x65d   :  { %1535 = vmatprep.subr.bf16.mxu0 %v3177_v5  ;;  %1576 = vmatprep.subr.bf16.mxu1 %v3180_v56 }
 0x660   :  { %1536 = vmatpush1.bf16.msra.mxu0 %v3183_v50  ;;  %1577 = vmatpush1.bf16.msra.mxu1 %v3186_v8  ;;  %v3426_v8 = vld [vmem:[#allocation39_spill] sm:$0xff] }
 0x661   :  { %1537 = vmatprep.subr.bf16.mxu0 %v3189_v55  ;;  %1578 = vmatprep.subr.bf16.mxu1 %v3192_v54  ;;  %v3427_v54 = vld [vmem:[#allocation37_spill] sm:$0xff] }
 0x664   :  { %1538 = vmatpush1.bf16.msra.mxu0 %v3195_v9  ;;  %1579 = vmatpush1.bf16.msra.mxu1 %v3198_v60 }
 0x665   :  { %1539 = vmatprep.subr.bf16.mxu0 %v3201_v46  ;;  %1580 = vmatprep.subr.bf16.mxu1 %v3204_v2 }
 0x668   :  { %1540 = vmatpush1.bf16.msra.mxu0 %v3207_v12  ;;  %1581 = vmatpush1.bf16.msra.mxu1 %v3210_v13 }
 0x669   :  { %1541 = vmatprep.subr.bf16.mxu0 %v3213_v15  ;;  %1582 = vmatprep.subr.bf16.mxu1 %v3216_v16 }
 0x66c   :  { %1542 = vmatpush1.bf16.msra.mxu0 %v3219_v17  ;;  %1583 = vmatpush1.bf16.msra.mxu1 %v3222_v18 }
 0x66d   :  { %1543 = vmatprep.subr.bf16.mxu0 %v3225_v19  ;;  %1584 = vmatprep.subr.bf16.mxu1 %v3228_v20 }
 0x670   :  { %1544 = vmatpush1.bf16.msra.mxu0 %v3273_v59  ;;  %1585 = vmatpush1.bf16.msra.mxu1 %v3276_v30 }
 0x671   :  { %2173 = vmatprep.subr.bf16.mxu0 %v2656_v52  ;;  %2193 = vmatprep.subr.bf16.mxu1 %v2656_v52 }
 0x713   :  { %v1441_v62 = vpop.f32.mrf.mxu0  ;;  %v1482_v49 = vpop.f32.mrf.mxu1 }
 0x714   :  { %v1489_v7 = vadd.f32 %v1441_v62, %v3424_v44  ;;  %v1491_v9 = vadd.f32 %v1482_v49, %v3427_v54 }
 0x715   :  { %v1443_v47 = vpop.f32.mrf.mxu0  ;;  %v1484_v41 = vpop.f32.mrf.mxu1 }
 0x716   :  { %v2097_v3 = vmul.f32 -1.442695, %v1489_v7  ;;  %v1490_v25 = vadd.f32 %v1443_v47, %v3425_v4  ;;  %v1492_v55 = vadd.f32 %v1484_v41, %v3426_v8 }
 0x717   :  { %v1445_v14 = vpop.f32.mrf.mxu0  ;;  %v1486_v48 = vpop.f32.mrf.mxu1 }
 0x718   :  { %2426 = vpow2.f32 %v2097_v3  ;;  %v2098_v5 = vmul.f32 -1.442695, %v1490_v25  ;;  %v2099_v60 = vmul.f32 -1.442695, %v1492_v55 }
 0x719   :  { %v1446_v56 = vpop.f32.mrf.mxu0  ;;  %v1487_v50 = vpop.f32.mrf.mxu1 }
 0x71a   :  { %2428 = vpow2.f32 %v2098_v5 }
 0x71b   :  { %2430 = vtanh.f32 %v1491_v9  ;;  %v2320_v9 = vld [vmem:[#allocation13 + $0x8] sm:$0xff]  }
 0x71c   :  { %2432 = vpow2.f32 %v2099_v60  ;;  %v2321_v60 = vld [vmem:[#allocation13] sm:$0xff]  }
 0x725   :  { %v2427_v46 = vpop.eup %2426 }
 0x726   :  { %v1496_v2 = vadd.f32 1.0, %v2427_v46  ;;  %v2322_v46 = vld [vmem:[#allocation14 + $0x38] sm:$0xff]  }
 0x727   :  { %v2429_v12 = vpop.eup %2428 }
 0x728   :  { %2434 = vrcp.f32 %v1496_v2  ;;  %v1502_v13 = vadd.f32 1.0, %v2429_v12  ;;  %v2431_v15 = vpop.eup %2430  ;;  %v2323_v2 = vld [vmem:[#allocation14 + $0x30] sm:$0xff]   ;;  %v2324_v12 = vld [vmem:[#allocation14 + $0x28] sm:$0xff]  }
 0x729   :  { %v2433_v16 = vpop.eup %2432 }
 0x72a   :  { %2436 = vrcp.f32 %v1502_v13  ;;  %v1509_v20 = vadd.f32 1.0, %v2433_v16  ;;  %v2325_v13 = vld [vmem:[#allocation14 + $0x20] sm:$0xff]   ;;  %v2327_v16 = vld [vmem:[#allocation14 + $0x10] sm:$0xff]  }
 0x72c   :  { %2438 = vrcp.f32 %v1509_v20 }
 0x735   :  { %v2435_v17 = vpop.eup %2434 }
 0x736   :  { %v1513_v18 = vmul.f32 %v2435_v17, %v2431_v15  ;;  %v2326_v15 = vld [vmem:[#allocation14 + $0x18] sm:$0xff]   ;;  %v2103_v17 = vld [vmem:[%s3382_s5] ss:$0 sm:$0xff] }
 0x737   :  { %v2437_v19 = vpop.eup %2436 }
 0x738   :  { %v1512_v26 = vmul.f32 %v2437_v19, %v3286_v34 }
 0x739   :  { %v2439_v30 = vpop.eup %2438 }
 0x73a   :  { %v3326_v59 = vadd.f32 %v1513_v18, %v1512_v26 }
 0x73c   :  { %2440 = vtanh.f32 %v3326_v59 }
 0x749   :  { %v2441_v36 = vpop.eup %2440 }
 0x74a   :  { %v1516_v37 = vmul.f32 %v2441_v36, %v2439_v30 }
 0x74c   :  { %v1528_v38 = vpack.c.bf16 %v1516_v37, %v1516_v37  ;;  %v2328_v37 = vld [vmem:[#allocation14 + $0x8] sm:$0xff]  }
 0x74e   :  { %1562 = vmatmul.mubr.bf16.vlgmr.msra.gmra.mxu0 %v1528_v38  ;;  %1603 = vmatmul.mubr.bf16.vlgmr.msra.gmra.mxu1 %v1528_v38  ;;  %v2329_v38 = vld [vmem:[#allocation14] sm:$0xff]  }
 0x74f   :  { %2174 = vmatpush3.bf16.msra.mxu0 %v2306_v58  ;;  %2189 = vmatprep.mubr.msk.bf16.mxu0 %vm2657_vm1, %v2656_v52  ;;  %v2112_v58 = vld [vmem:[%s3384_s7] ss:$0 sm:$0xff]  ;;  %s2658_s7 = smov [#allocation16]  }
 0x750   :  { %2175 = vmatprep.subr.bf16.mxu0 %v2656_v52  ;;  %2209 = vmatprep.mubr.msk.bf16.mxu1 %vm2657_vm1, %v2656_v52  ;;  %s2003_s27 = sshll.u32 %s2658_s7, 4  ;;  %s2004_s27 = int_to_ptr.vmem [resolvable:$true] %s2003_s27 }
 0x751   :  { %2194 = vmatpush3.bf16.msra.mxu1 %v2314_v6  ;;  %v3428_v6 = vlaneseq  ;;  %p2619_p3 = scmp.lt.s32.totalorder %s2004_s27, %s2004_s27 }
 0x752   :  { %2195 = vmatprep.subr.bf16.mxu1 %v2656_v52 }
 0x753   :  { %2176 = vmatpush3.bf16.msra.mxu0 %v2307_v43 }
 0x754   :  { %2177 = vmatprep.subr.bf16.mxu0 %v2656_v52 }
 0x755   :  { %2196 = vmatpush3.bf16.msra.mxu1 %v2315_v51  ;;  %v1983_v51 = vand.u32 127, %v3428_v6 }
 0x756   :  { %2197 = vmatprep.subr.bf16.mxu1 %v2656_v52 }
 0x757   :  { %2178 = vmatpush3.bf16.msra.mxu0 %v2308_v63  ;;  %vm1984_vm2 = vcmp.lt.s32.totalorder %v1983_v51, 10 }
 0x758   :  { %2179 = vmatprep.subr.bf16.mxu0 %v2656_v52 }
 0x759   :  { %2198 = vmatpush3.bf16.msra.mxu1 %v2316_v21 }
 0x75a   :  { %2199 = vmatprep.subr.bf16.mxu1 %v2656_v52 }
 0x75b   :  { %2180 = vmatpush3.bf16.msra.mxu0 %v2309_v53 }
 0x75c   :  { %2181 = vmatprep.subr.bf16.mxu0 %v2656_v52 }
 0x75d   :  { %2200 = vmatpush3.bf16.msra.mxu1 %v2317_v23 }
 0x75e   :  { %2201 = vmatprep.subr.bf16.mxu1 %v2656_v52 }
 0x75f   :  { %2182 = vmatpush3.bf16.msra.mxu0 %v2310_v10 }
 0x760   :  { %2183 = vmatprep.subr.bf16.mxu0 %v2656_v52 }
 0x761   :  { %2202 = vmatpush3.bf16.msra.mxu1 %v2318_v1 }
 0x762   :  { %2203 = vmatprep.subr.bf16.mxu1 %v2656_v52 }
 0x763   :  { %2184 = vmatpush3.bf16.msra.mxu0 %v2311_v45 }
 0x764   :  { %2185 = vmatprep.subr.bf16.mxu0 %v2656_v52 }
 0x765   :  { %2204 = vmatpush3.bf16.msra.mxu1 %v2319_v24 }
 0x766   :  { %2205 = vmatprep.subr.bf16.mxu1 %v2656_v52 }
 0x767   :  { %2186 = vmatpush3.bf16.msra.mxu0 %v2312_v11 }
 0x768   :  { %2187 = vmatprep.subr.bf16.mxu0 %v2656_v52 }
 0x769   :  { %2206 = vmatpush3.bf16.msra.mxu1 %v2320_v9 }
 0x76a   :  { %2207 = vmatprep.subr.bf16.mxu1 %v2656_v52 }
 0x76b   :  { %2188 = vmatpush3.bf16.msra.mxu0 %v2313_v32 }
 0x76c   :  { %2213 = vmatprep.subr.bf16.mxu0 %v2656_v52 }
 0x76d   :  { %2208 = vmatpush3.bf16.msra.mxu1 %v2321_v60 }
 0x80e   :  { %v1563_v22 = vpop.f32.mrf.mxu0  ;;  %v1604_v27 = vpop.f32.mrf.mxu1 }
 0x80f   :  { %v1611_v28 = vadd.f32 %v1563_v22, %v2999_v61  ;;  %v1613_v7 = vadd.f32 %v1604_v27, %v3002_v57 }
 0x810   :  { %v1565_v29 = vpop.f32.mrf.mxu0  ;;  %v1606_v31 = vpop.f32.mrf.mxu1 }
 0x811   :  { %v2100_v34 = vmul.f32 -1.442695, %v1611_v28  ;;  %v1612_v33 = vadd.f32 %v1565_v29, %v3005_v0  ;;  %v1614_v44 = vadd.f32 %v1606_v31, %v3008_v42 }
 0x812   :  { %v1567_v39 = vpop.f32.mrf.mxu0  ;;  %v1608_v35 = vpop.f32.mrf.mxu1 }
 0x813   :  { %2442 = vpow2.f32 %v2100_v34  ;;  %v2101_v40 = vmul.f32 -1.442695, %v1612_v33  ;;  %v2102_v47 = vmul.f32 -1.442695, %v1614_v44 }
 0x814   :  { %v1568_v62 = vpop.f32.mrf.mxu0  ;;  %v1609_v49 = vpop.f32.mrf.mxu1 }
 0x815   :  { %2444 = vpow2.f32 %v2101_v40 }
 0x816   :  { %2446 = vtanh.f32 %v1613_v7 }
 0x817   :  { %2448 = vpow2.f32 %v2102_v47 }
 0x820   :  { %v2443_v41 = vpop.eup %2442 }
 0x821   :  { %v1618_v3 = vadd.f32 1.0, %v2443_v41 }
 0x822   :  { %v2445_v61 = vpop.eup %2444 }
 0x823   :  { %2450 = vrcp.f32 %v1618_v3  ;;  %v1624_v4 = vadd.f32 1.0, %v2445_v61  ;;  %v2447_v0 = vpop.eup %2446 }
 0x824   :  { %v2449_v25 = vpop.eup %2448 }
 0x825   :  { %2452 = vrcp.f32 %v1624_v4  ;;  %v1631_v56 = vadd.f32 1.0, %v2449_v25 }
 0x827   :  { %2454 = vrcp.f32 %v1631_v56 }
 0x830   :  { %v2451_v14 = vpop.eup %2450 }
 0x831   :  { %v1635_v48 = vmul.f32 %v2451_v14, %v2447_v0 }
 0x832   :  { %v2453_v5 = vpop.eup %2452 }
 0x833   :  { %v1634_v50 = vmul.f32 %v2453_v5, %v3326_v59 }
 0x834   :  { %v2455_v57 = vpop.eup %2454 }
 0x835   :  { %v1636_v42 = vadd.f32 %v1635_v48, %v1634_v50 }
 0x837   :  { %2456 = vtanh.f32 %v1636_v42 }
 0x844   :  { %v2457_v8 = vpop.eup %2456 }
 0x845   :  { %v1638_v55 = vmul.f32 %v2457_v8, %v2455_v57 }
 0x847   :  { %v1644_v54 = vpack.c.bf16 %v1638_v55, %v1638_v55 }
 0x849   :  { %2190 = vmatmul.mubr.bf16.vlgmr.msra.gmra.mxu0 %v1644_v54 }
 0x84a   :  { %2229 = vmatprep.mubr.msk.bf16.mxu0 %vm2657_vm1, %v2656_v52  ;;  %2214 = vmatpush3.bf16.msra.mxu0 %v2322_v46 }
 0x84b   :  { %2215 = vmatprep.subr.bf16.mxu0 %v2656_v52 }
 0x84e   :  { %2216 = vmatpush3.bf16.msra.mxu0 %v2323_v2 }
 0x84f   :  { %2217 = vmatprep.subr.bf16.mxu0 %v2656_v52 }
 0x852   :  { %2218 = vmatpush3.bf16.msra.mxu0 %v2324_v12 }
 0x853   :  { %2219 = vmatprep.subr.bf16.mxu0 %v2656_v52 }
 0x856   :  { %2220 = vmatpush3.bf16.msra.mxu0 %v2325_v13 }
 0x857   :  { %2221 = vmatprep.subr.bf16.mxu0 %v2656_v52 }
 0x85a   :  { %2222 = vmatpush3.bf16.msra.mxu0 %v2326_v15 }
 0x85b   :  { %2223 = vmatprep.subr.bf16.mxu0 %v2656_v52 }
 0x85e   :  { %2224 = vmatpush3.bf16.msra.mxu0 %v2327_v16 }
 0x85f   :  { %2225 = vmatprep.subr.bf16.mxu0 %v2656_v52 }
 0x862   :  { %2226 = vmatpush3.bf16.msra.mxu0 %v2328_v37 }
 0x863   :  { %2227 = vmatprep.subr.bf16.mxu0 %v2656_v52  ;;  %v2121_v52 = vld [vmem:[%s3386_s9] ss:$0 sm:$0xff]  ;;  %s2614_s9 = scalar_lea.vmem %s2004_s27, 128 }
 0x864   :  { %p2615_p2 = scmp.ne.s32.totalorder %s2004_s27, %s2614_s9  ;;  %p2620_p4 = scmp.lt.s32.totalorder %s2614_s9, %s2614_s9 }
 0x866   :  { %2228 = vmatpush3.bf16.msra.mxu0 %v2329_v38  ;;  %p2621_p5 = por %p2620_p4, %p2619_p3 }
 0x868   :  { %p2622_p6 = pnand %p2621_p5, %p2615_p2 }
 0x909   :  { %v1750_v18 = vpop.f32.mrf.mxu0 }
 0x90a   :  { %v1751_v19 = vadd.f32 %v2103_v17, %v1750_v18 }
 0x90b   :  { %v2191_v20 = vpop.f32.mrf.mxu0 }
 0x90c   :  { %v1756_v26 = vmax.f32 %v1751_v19, 0.0 }
 0x90d   :  { %v1753_v59 = vpop.f32.mrf.mxu0 }
 0x90e   :  { %v1757_v30 = vpack.c.bf16 %v1756_v26, %v1756_v26 }
 0x90f   :  { %v2192_v36 = vpop.f32.mrf.mxu0 }
 0x910   :  { %2210 = vmatmul.mubr.bf16.vlgmr.msra.gmra.mxu1 %v1757_v30 }
 0x9d0   :  { %v1863_v43 = vpop.f32.mrf.mxu1 }
 0x9d1   :  { %v1864_v63 = vadd.f32 %v2112_v58, %v1863_v43 }
 0x9d2   :  { %v2211_v53 = vpop.f32.mrf.mxu1 }
 0x9d3   :  { %v1869_v10 = vmax.f32 %v1864_v63, 0.0 }
 0x9d4   :  { %v1866_v45 = vpop.f32.mrf.mxu1 }
 0x9d5   :  { %v1870_v11 = vpack.c.bf16 %v1869_v10, %v1869_v10 }
 0x9d6   :  { %v2212_v32 = vpop.f32.mrf.mxu1 }
 0x9d7   :  { %2230 = vmatmul.mubr.bf16.vlgmr.msra.gmra.mxu0 %v1870_v11 }
 0xa97   :  { %v1976_v21 = vpop.f32.mrf.mxu0 }
 0xa98   :  { %v1977_v23 = vadd.f32 %v2121_v52, %v1976_v21 }
 0xa99   :  { %v2231_v1 = vpop.f32.mrf.mxu0 }
 0xa9a   :  { %v1985_v24 = vsel %vm1984_vm2, %v1977_v23, -1e+30 }
 0xa9b   :  { %1986 = vmax.xlane.f32.xlu0 %v1985_v24  ;;  %v1979_v22 = vpop.f32.mrf.mxu0 }
 0xa9d   :  { %v2232_v27 = vpop.f32.mrf.mxu0 }
 0xb24   :  { %v1987_v28 = vpop.xlane.xlu0 %1986 }
 0xb25   :  { %v1988_v29 = vsub.f32 %v1985_v24, %v1987_v28 }
 0xb27   :  { %v1989_v31 = vmul.f32 1.442695, %v1988_v29 }
 0xb29   :  { %2458 = vpow2.f32 %v1989_v31 }
 0xb36   :  { %v2459_v34 = vpop.eup %2458 }
 0xb37   :  { %1991 = vadd.xlane.f32.xlu0 %v2459_v34 }
 0xbc0   :  { %v1992_v33 = vpop.xlane.xlu0 %1991 }
 0xbc1   :  { %2460 = vlog2.f32 %v1992_v33 }
 0xbce   :  { %v2461_v39 = vpop.eup %2460 }
 0xbcf   :  { %v1994_v35 = vmul.f32 0.6931472, %v2461_v39 }
 0xbd1   :  { %v1995_v40 = vsub.f32 %v1988_v29, %v1994_v35 }
 0xbd3   :  { %1996 = vst [vmem:[#allocation16] sm:$0xff] %v1995_v40 }
 0xbd4   :  { %2625 = shalt.err (!%p2622_p6)
}
 0xbd5   :  { %2006 = dma.vmem_to_hbm [thread:$0]  %s2004_s27, 128, %s3387_s10, [#allocation7]  }
 0xbd6   :  { %2642 = dma.done.wait [#allocation7], 128  }
 0xbd7   :  { %2643 = vsyncadd [#allocation7], 4294967168 }
 0xbd8   :  { %2010 = vsyncpa [#allocation6], 1 }
 0xbd9   :  { %2011 = vsyncpa [#allocation9], 1 }
 0xbda   :  { %2012 = vsyncpa [#allocation12], 1 }
 0xbdb   :  { %2013 = vsyncpa [#allocation15], 1 }
 0xbdc   :  { %2014 = vsyncpa [#allocation7], 1 }

</bundles_post_ra>
